<compile_context>
chip_gen: v6e
topology: v6e:2x2x1
jax: 0.10.0
libtpu: 0.0.40
codegen_flags: <defaults>
</compile_context>

<pallas_src>
import functools
import math

import jax
import jax.numpy as jnp
from jax.experimental import pallas as pl
from jax.experimental.pallas import tpu as pltpu

# Set to jnp.bfloat16 on v6e/v7x for ~2x MXU throughput and halved weight
# streaming; accumulation stays f32. Kept f32 here for exact reference match.
MXU_INPUT_DTYPE = jnp.float32


# ----------------------------- tiling helpers -----------------------------

def _pick_tile(dim, candidates):
    """Largest candidate tile that evenly divides `dim`; else the full dim."""
    for c in candidates:
        if dim >= c and dim % c == 0:
            return c
    return dim


_M_TILES = (256, 128, 64, 32, 16, 8)      # sublane-aligned
_N_TILES = (512, 256, 128)                # lane-aligned (multiples of 128)
_K_TILES = (512, 256, 128)


# ----------------------------- Pallas kernels -----------------------------

def _linear_kernel(x_ref, w_ref, b_ref, o_ref, acc_ref, *, act):
    """One (tm, tn) output tile; K is the last ('arbitrary') grid axis."""
    @pl.when(pl.program_id(2) == 0)
    def _():
        acc_ref[...] = jnp.zeros_like(acc_ref)

    x = x_ref[...].astype(MXU_INPUT_DTYPE)
    w = w_ref[...].astype(MXU_INPUT_DTYPE)
    acc_ref[...] += jnp.dot(x, w, preferred_element_type=jnp.float32)

    @pl.when(pl.program_id(2) == pl.num_programs(2) - 1)
    def _():
        y = acc_ref[...] + b_ref[...].astype(jnp.float32)
        if act == "gelu":
            # TODO(synk): config.hidden_act='gelu' (exact erf) differs slightly
            # from this tanh approximation ('gelu_new').
            y = 0.5 * y * (1.0 + jnp.tanh(
                0.7978845608028654 * (y + 0.044715 * y * y * y)))
        o_ref[...] = y.astype(o_ref.dtype)


def _layernorm_kernel(x_ref, g_ref, b_ref, o_ref, *, eps):
    x = x_ref[...].astype(jnp.float32)
    mean = jnp.mean(x, axis=-1, keepdims=True)
    var = jnp.mean(jnp.square(x - mean), axis=-1, keepdims=True)
    y = (x - mean) * jax.lax.rsqrt(var + eps)
    o_ref[...] = (y * g_ref[...] + b_ref[...]).astype(o_ref.dtype)


def _residual_layernorm_kernel(x_ref, r_ref, g_ref, b_ref, o_ref, *, eps):
    # LayerNorm(x + residual) fused — saves an HBM round trip of [M, H].
    x = x_ref[...].astype(jnp.float32) + r_ref[...].astype(jnp.float32)
    mean = jnp.mean(x, axis=-1, keepdims=True)
    var = jnp.mean(jnp.square(x - mean), axis=-1, keepdims=True)
    y = (x - mean) * jax.lax.rsqrt(var + eps)
    o_ref[...] = (y * g_ref[...] + b_ref[...]).astype(o_ref.dtype)


def _attention_body(q_ref, k_ref, v_ref, m_ref, ctx_ref, p_ref, scale):
    # One batch element per grid step; all heads processed together.
    q = q_ref[0].astype(jnp.float32)          # (nH, S, dh)
    k = k_ref[0].astype(jnp.float32)          # (nH, S, dh)
    v = v_ref[0].astype(jnp.float32)          # (nH, S, dh)

    # scores[h, i, j] = sum_d q[h, i, d] * k[h, j, d]   (no explicit k.T)
    scores = jax.lax.dot_general(
        q, k, (((2,), (2,)), ((0,), (0,))),
        preferred_element_type=jnp.float32) * scale
    # additive mask: (1, S) broadcast over heads and query positions
    scores = scores + m_ref[0].astype(jnp.float32)

    scores = scores - jnp.max(scores, axis=-1, keepdims=True)
    e = jnp.exp(scores)
    p = e / jnp.sum(e, axis=-1, keepdims=True)

    if p_ref is not None:
        p_ref[0] = p.astype(p_ref.dtype)

    # ctx[h, i, d] = sum_j p[h, i, j] * v[h, j, d]
    ctx = jax.lax.dot_general(
        p, v, (((2,), (1,)), ((0,), (0,))),
        preferred_element_type=jnp.float32)
    ctx_ref[0] = ctx.astype(ctx_ref.dtype)


def _attention_kernel_probs(q_ref, k_ref, v_ref, m_ref, ctx_ref, p_ref, *, scale):
    _attention_body(q_ref, k_ref, v_ref, m_ref, ctx_ref, p_ref, scale)


def _attention_kernel_noprobs(q_ref, k_ref, v_ref, m_ref, ctx_ref, *, scale):
    _attention_body(q_ref, k_ref, v_ref, m_ref, ctx_ref, None, scale)


# ----------------------------- pallas_call wrappers -----------------------------

def linear(x, w, b, act=None):
    M, K = x.shape
    N = w.shape[1]
    tm = _pick_tile(M, _M_TILES)
    tn = _pick_tile(N, _N_TILES)
    tk = _pick_tile(K, _K_TILES)
    grid = (M // tm, N // tn, K // tk)
    return pl.pallas_call(
        functools.partial(_linear_kernel, act=act),
        out_shape=jax.ShapeDtypeStruct((M, N), x.dtype),
        grid=grid,
        in_specs=[pl.BlockSpec((tm, tk), lambda i, j, k: (i, k)),
                  pl.BlockSpec((tk, tn), lambda i, j, k: (k, j)),
                  pl.BlockSpec((1, tn), lambda i, j, k: (0, j))],
        out_specs=pl.BlockSpec((tm, tn), lambda i, j, k: (i, j)),
        scratch_shapes=[pltpu.VMEM((tm, tn), jnp.float32)],
        compiler_params=pltpu.CompilerParams(
            dimension_semantics=("parallel", "parallel", "arbitrary")),
    )(x, w, b.reshape(1, N))


def layernorm(x, gamma, beta, eps=1e-12):
    M, H = x.shape
    tm = _pick_tile(M, _M_TILES)
    return pl.pallas_call(
        functools.partial(_layernorm_kernel, eps=eps),
        out_shape=jax.ShapeDtypeStruct((M, H), x.dtype),
        grid=(M // tm,),
        in_specs=[pl.BlockSpec((tm, H), lambda i: (i, 0)),
                  pl.BlockSpec((1, H), lambda i: (0, 0)),
                  pl.BlockSpec((1, H), lambda i: (0, 0))],
        out_specs=pl.BlockSpec((tm, H), lambda i: (i, 0)),
        compiler_params=pltpu.CompilerParams(dimension_semantics=("parallel",)),
    )(x, gamma.reshape(1, H), beta.reshape(1, H))


def residual_layernorm(x, residual, gamma, beta, eps=1e-12):
    M, H = x.shape
    tm = _pick_tile(M, _M_TILES)
    return pl.pallas_call(
        functools.partial(_residual_layernorm_kernel, eps=eps),
        out_shape=jax.ShapeDtypeStruct((M, H), x.dtype),
        grid=(M // tm,),
        in_specs=[pl.BlockSpec((tm, H), lambda i: (i, 0)),
                  pl.BlockSpec((tm, H), lambda i: (i, 0)),
                  pl.BlockSpec((1, H), lambda i: (0, 0)),
                  pl.BlockSpec((1, H), lambda i: (0, 0))],
        out_specs=pl.BlockSpec((tm, H), lambda i: (i, 0)),
        compiler_params=pltpu.CompilerParams(dimension_semantics=("parallel",)),
    )(x, residual, gamma.reshape(1, H), beta.reshape(1, H))


def attention(q, k, v, add_mask, scale, output_attentions=True):
    # q, k, v: (B, nH, S, dh);  add_mask: (B, 1, S) additive mask
    B, nH, S, dh = q.shape
    qkv_spec = pl.BlockSpec((1, nH, S, dh), lambda b: (b, 0, 0, 0))
    mask_spec = pl.BlockSpec((1, 1, S), lambda b: (b, 0, 0))

    out_shapes = [jax.ShapeDtypeStruct((B, nH, S, dh), q.dtype)]
    out_specs = [pl.BlockSpec((1, nH, S, dh), lambda b: (b, 0, 0, 0))]
    if output_attentions:
        out_shapes.append(jax.ShapeDtypeStruct((B, nH, S, S), q.dtype))
        out_specs.append(pl.BlockSpec((1, nH, S, S), lambda b: (b, 0, 0, 0)))
        kernel = functools.partial(_attention_kernel_probs, scale=scale)
    else:
        kernel = functools.partial(_attention_kernel_noprobs, scale=scale)

    outs = pl.pallas_call(
        kernel,
        out_shape=tuple(out_shapes),
        grid=(B,),
        in_specs=[qkv_spec, qkv_spec, qkv_spec, mask_spec],
        out_specs=tuple(out_specs),
        compiler_params=pltpu.CompilerParams(dimension_semantics=("parallel",)),
    )(q, k, v, add_mask)

    if output_attentions:
        return outs[0], outs[1]
    return outs[0], None


# ----------------------------- model glue -----------------------------

def init_params(key, cfg):
    H = cfg["hidden_size"]
    I = cfg["intermediate_size"]
    std = cfg["initializer_range"]
    keys = iter(jax.random.split(key, 64))

    def nrm(shape):
        return jax.random.normal(next(keys), shape, jnp.float32) * std

    params = {
        "word_emb": nrm((cfg["vocab_size"], H)),
        "pos_emb": nrm((cfg["max_position_embeddings"], H)),
        "type_emb": nrm((cfg["type_vocab_size"], H)),
        "emb_ln_g": jnp.ones((H,), jnp.float32),
        "emb_ln_b": jnp.zeros((H,), jnp.float32),
        "layers": [],
    }
    for _ in range(cfg["num_hidden_layers"]):
        params["layers"].append({
            # fused Q|K|V projection: (H, 3H)
            "qkv_w": nrm((H, 3 * H)), "qkv_b": jnp.zeros((3 * H,), jnp.float32),
            "ao_w": nrm((H, H)), "ao_b": jnp.zeros((H,), jnp.float32),
            "aln_g": jnp.ones((H,), jnp.float32), "aln_b": jnp.zeros((H,), jnp.float32),
            "i_w": nrm((H, I)), "i_b": jnp.zeros((I,), jnp.float32),
            "o_w": nrm((I, H)), "o_b": jnp.zeros((H,), jnp.float32),
            "oln_g": jnp.ones((H,), jnp.float32), "oln_b": jnp.zeros((H,), jnp.float32),
        })
    return params


def bert_layer(hidden, add_mask, lp, num_heads, output_attentions=True):
    B, S, H = hidden.shape
    dh = H // num_heads
    x = hidden.reshape(B * S, H)

    # Fused Q/K/V projection: x read from HBM once instead of 3x.
    qkv = linear(x, lp["qkv_w"], lp["qkv_b"])                       # (B*S, 3H)
    qkv = qkv.reshape(B, S, 3, num_heads, dh).transpose(2, 0, 3, 1, 4)
    q, k, v = qkv[0], qkv[1], qkv[2]                                # (B, nH, S, dh)

    ctx, probs = attention(q, k, v, add_mask, 1.0 / math.sqrt(dh),
                           output_attentions=output_attentions)
    ctx = ctx.transpose(0, 2, 1, 3).reshape(B * S, H)

    attn_out = linear(ctx, lp["ao_w"], lp["ao_b"])
    attn_ln = residual_layernorm(attn_out, x, lp["aln_g"], lp["aln_b"])

    inter = linear(attn_ln, lp["i_w"], lp["i_b"], act="gelu")
    ffn_out = linear(inter, lp["o_w"], lp["o_b"])
    out = residual_layernorm(ffn_out, attn_ln, lp["oln_g"], lp["oln_b"])

    if output_attentions:
        probs = probs.reshape(B, num_heads, S, S)
    return out.reshape(B, S, H), probs


def bert_crop_forward(params, input_ids, cfg,
                      token_type_ids=None, attention_mask=None, position_ids=None):
    B, S = input_ids.shape
    H = cfg["hidden_size"]
    nH = cfg["num_attention_heads"]

    if attention_mask is None:
        attention_mask = jnp.ones((B, S), jnp.float32)
    if token_type_ids is None:
        token_type_ids = jnp.zeros((B, S), jnp.int32)
    if position_ids is None:
        position_ids = jnp.broadcast_to(jnp.arange(S, dtype=jnp.int32)[None, :], (B, S))

    # (1 - mask) * -10000 kept tiny as (B, 1, S); broadcast happens in-kernel.
    add_mask = ((1.0 - attention_mask.astype(jnp.float32)) * -10000.0)[:, None, :]

    # embeddings (gather is glue; LayerNorm runs in a Pallas kernel)
    we = jnp.take(params["word_emb"], input_ids, axis=0)
    pe = jnp.take(params["pos_emb"], position_ids, axis=0)
    te = jnp.take(params["type_emb"], token_type_ids, axis=0)
    emb = (we + pe + te).reshape(B * S, H)
    hidden = layernorm(emb, params["emb_ln_g"], params["emb_ln_b"]).reshape(B, S, H)
    # dropout omitted (inference semantics)

    all_hidden_states = ()
    all_attentions = ()
    for lp in params["layers"]:
        all_hidden_states = all_hidden_states + (hidden,)
        hidden, probs = bert_layer(hidden, add_mask, lp, nH, output_attentions=True)
        all_attentions = all_attentions + (probs,)
    all_hidden_states = all_hidden_states + (hidden,)

    # matches (hidden_states, all_hidden_states, all_attentions)
    return (hidden, all_hidden_states, all_attentions)


if __name__ == "__main__":
    cfg = dict(
        vocab_size=100,
        hidden_size=32,
        num_attention_heads=4,
        intermediate_size=64,
        num_hidden_layers=2,
        max_position_embeddings=64,
        type_vocab_size=2,
        initializer_range=0.02,
    )
    key = jax.random.PRNGKey(0)
    pkey, dkey = jax.random.split(key)
    params = init_params(pkey, cfg)

    B, S = 2, 8
    input_ids = jax.random.randint(dkey, (B, S), 0, cfg["vocab_size"], dtype=jnp.int32)

    fwd = jax.jit(functools.partial(bert_crop_forward, cfg=cfg))
    outputs = fwd(params, input_ids)
    jax.tree_util.tree_map(jax.block_until_ready, outputs)

    hidden, all_hidden, all_attn = outputs
    assert hidden.shape == (B, S, cfg["hidden_size"])
    assert len(all_hidden) == cfg["num_hidden_layers"] + 1
    assert len(all_attn) == cfg["num_hidden_layers"]
    assert all_attn[0].shape == (B, cfg["num_attention_heads"], S, S)
    print("KERNEL_OK")
</pallas_src>

<mosaic_0001>
module attributes {stable_mosaic.version = 11 : i64} {
  func.func @_linear_kernel(%arg0: i32, %arg1: i32, %arg2: i32, %arg3: memref<16x32xf32, #tpu.memory_space<vmem>>, %arg4: memref<32x96xf32, #tpu.memory_space<vmem>>, %arg5: memref<1x96xf32, #tpu.memory_space<vmem>>, %arg6: memref<16x96xf32, #tpu.memory_space<vmem>>, %arg7: memref<16x96xf32, #tpu.memory_space<vmem>>) attributes {dimension_semantics = [#tpu.dimension_semantics<parallel>, #tpu.dimension_semantics<parallel>, #tpu.dimension_semantics<arbitrary>], iteration_bounds = array<i64: 1, 1, 1>, scalar_prefetch = 0 : i64, scratch_operands = 1 : i64, tpu.core_type = #tpu.core_type<tc>, window_params = [{transform_indices = @transform_0, window_bounds = array<i64: 16, 32>}, {transform_indices = @transform_1, window_bounds = array<i64: 32, 96>}, {transform_indices = @transform_2, window_bounds = array<i64: 1, 96>}, {transform_indices = @transform_3, window_bounds = array<i64: 16, 96>}]} {
    %c0_i32 = arith.constant 0 : i32
    %0 = arith.cmpi eq, %arg2, %c0_i32 : i32
    %1 = arith.extui %0 : i1 to i32
    %c0_i32_0 = arith.constant 0 : i32
    %2 = arith.cmpi ne, %1, %c0_i32_0 : i32
    scf.if %2 {
      %cst_10 = arith.constant 0.000000e+00 : f32
      %12 = vector.broadcast %cst_10 : f32 to vector<16x96xf32>
      %c0_11 = arith.constant 0 : index
      %c0_12 = arith.constant 0 : index
      %13 = vector.load %arg7[%c0_11, %c0_12] : memref<16x96xf32, #tpu.memory_space<vmem>>, vector<16x96xf32>
      tpu.vector_store %arg7[%c0_11, %c0_12], %12 {strides = array<i32>} : memref<16x96xf32, #tpu.memory_space<vmem>>, vector<16x96xf32>,
    } else {
    }
    %c0 = arith.constant 0 : index
    %c0_1 = arith.constant 0 : index
    %3 = vector.load %arg3[%c0, %c0_1] : memref<16x32xf32, #tpu.memory_space<vmem>>, vector<16x32xf32>
    %c0_2 = arith.constant 0 : index
    %c0_3 = arith.constant 0 : index
    %4 = vector.load %arg4[%c0_2, %c0_3] : memref<32x96xf32, #tpu.memory_space<vmem>>, vector<32x96xf32>
    %c0_4 = arith.constant 0 : index
    %c0_5 = arith.constant 0 : index
    %5 = vector.load %arg7[%c0_4, %c0_5] : memref<16x96xf32, #tpu.memory_space<vmem>>, vector<16x96xf32>
    %cst = arith.constant dense<0.000000e+00> : vector<16x96xf32>
    %6 = tpu.matmul %3, %4, %cst {dimension_numbers = #tpu.dot_dimension_numbers<[1], [0], [0], [1], [0, 0, 1, 1], [], []>} : vector<16x32xf32>, vector<32x96xf32>, vector<16x96xf32> -> vector<16x96xf32>
    %7 = arith.addf %5, %6 : vector<16x96xf32>
    %c0_6 = arith.constant 0 : index
    %c0_7 = arith.constant 0 : index
    %8 = vector.load %arg7[%c0_6, %c0_7] : memref<16x96xf32, #tpu.memory_space<vmem>>, vector<16x96xf32>
    tpu.vector_store %arg7[%c0_6, %c0_7], %7 {strides = array<i32>} : memref<16x96xf32, #tpu.memory_space<vmem>>, vector<16x96xf32>,
    %c0_i32_8 = arith.constant 0 : i32
    %9 = arith.cmpi eq, %arg2, %c0_i32_8 : i32
    %10 = arith.extui %9 : i1 to i32
    %c0_i32_9 = arith.constant 0 : i32
    %11 = arith.cmpi ne, %10, %c0_i32_9 : i32
    scf.if %11 {
      %c0_10 = arith.constant 0 : index
      %c0_11 = arith.constant 0 : index
      %12 = vector.load %arg7[%c0_10, %c0_11] : memref<16x96xf32, #tpu.memory_space<vmem>>, vector<16x96xf32>
      %c0_12 = arith.constant 0 : index
      %c0_13 = arith.constant 0 : index
      %13 = vector.load %arg5[%c0_12, %c0_13] : memref<1x96xf32, #tpu.memory_space<vmem>>, vector<1x96xf32>
      %14 = vector.broadcast %13 : vector<1x96xf32> to vector<16x96xf32>
      %15 = arith.addf %12, %14 : vector<16x96xf32>
      %c0_14 = arith.constant 0 : index
      %c0_15 = arith.constant 0 : index
      %16 = vector.load %arg6[%c0_14, %c0_15] : memref<16x96xf32, #tpu.memory_space<vmem>>, vector<16x96xf32>
      tpu.vector_store %arg6[%c0_14, %c0_15], %15 {strides = array<i32>} : memref<16x96xf32, #tpu.memory_space<vmem>>, vector<16x96xf32>,
    } else {
    }
    return
  }
  func.func @transform_0(%arg0: i32, %arg1: i32, %arg2: i32) -> (i32, i32) {
    %c0_i32 = arith.constant 0 : i32
    return %arg0, %arg2 : i32, i32
  }
  func.func @transform_1(%arg0: i32, %arg1: i32, %arg2: i32) -> (i32, i32) {
    %c0_i32 = arith.constant 0 : i32
    return %arg2, %arg1 : i32, i32
  }
  func.func @transform_2(%arg0: i32, %arg1: i32, %arg2: i32) -> (i32, i32) {
    %c0_i32 = arith.constant 0 : i32
    %c0_i32_0 = arith.constant 0 : i32
    return %c0_i32, %arg1 : i32, i32
  }
  func.func @transform_3(%arg0: i32, %arg1: i32, %arg2: i32) -> (i32, i32) {
    %c0_i32 = arith.constant 0 : i32
    return %arg0, %arg1 : i32, i32
  }
}

module attributes {stable_mosaic.version = 11 : i64} {
  func.func @_layernorm_kernel(%arg0: i32, %arg1: memref<16x32xf32, #tpu.memory_space<vmem>>, %arg2: memref<1x32xf32, #tpu.memory_space<vmem>>, %arg3: memref<1x32xf32, #tpu.memory_space<vmem>>, %arg4: memref<16x32xf32, #tpu.memory_space<vmem>>) attributes {dimension_semantics = [#tpu.dimension_semantics<parallel>], iteration_bounds = array<i64: 1>, scalar_prefetch = 0 : i64, scratch_operands = 0 : i64, tpu.core_type = #tpu.core_type<tc>, window_params = [{transform_indices = @transform_0, window_bounds = array<i64: 16, 32>}, {pipeline_mode = #tpu.pipeline_mode<synchronous>, transform_indices = @transform_1, window_bounds = array<i64: 1, 32>}, {pipeline_mode = #tpu.pipeline_mode<synchronous>, transform_indices = @transform_2, window_bounds = array<i64: 1, 32>}, {transform_indices = @transform_3, window_bounds = array<i64: 16, 32>}]} {
    %c0 = arith.constant 0 : index
    %c0_0 = arith.constant 0 : index
    %0 = vector.load %arg1[%c0, %c0_0] : memref<16x32xf32, #tpu.memory_space<vmem>>, vector<16x32xf32>
    %cst = arith.constant dense<0.000000e+00> : vector<16xf32>
    %1 = vector.multi_reduction <add>, %0, %cst [1] : vector<16x32xf32> to vector<16xf32>
    %2 = vector.shape_cast %1 : vector<16xf32> to vector<16x1xf32>
    %cst_1 = arith.constant 3.200000e+01 : f32
    %3 = vector.broadcast %cst_1 : f32 to vector<16x1xf32>
    %4 = arith.divf %2, %3 : vector<16x1xf32>
    %5 = vector.broadcast %4 : vector<16x1xf32> to vector<16x32xf32>
    %6 = arith.subf %0, %5 : vector<16x32xf32>
    %7 = arith.mulf %6, %6 : vector<16x32xf32>
    %cst_2 = arith.constant dense<0.000000e+00> : vector<16xf32>
    %8 = vector.multi_reduction <add>, %7, %cst_2 [1] : vector<16x32xf32> to vector<16xf32>
    %9 = vector.shape_cast %8 : vector<16xf32> to vector<16x1xf32>
    %cst_3 = arith.constant 3.200000e+01 : f32
    %10 = vector.broadcast %cst_3 : f32 to vector<16x1xf32>
    %11 = arith.divf %9, %10 : vector<16x1xf32>
    %12 = vector.broadcast %4 : vector<16x1xf32> to vector<16x32xf32>
    %13 = arith.subf %0, %12 : vector<16x32xf32>
    %cst_4 = arith.constant 9.99999996E-13 : f32
    %14 = vector.broadcast %cst_4 : f32 to vector<16x1xf32>
    %15 = arith.addf %11, %14 : vector<16x1xf32>
    %16 = math.rsqrt %15 : vector<16x1xf32>
    %17 = vector.broadcast %16 : vector<16x1xf32> to vector<16x32xf32>
    %18 = arith.mulf %13, %17 : vector<16x32xf32>
    %c0_5 = arith.constant 0 : index
    %c0_6 = arith.constant 0 : index
    %19 = vector.load %arg2[%c0_5, %c0_6] : memref<1x32xf32, #tpu.memory_space<vmem>>, vector<1x32xf32>
    %20 = vector.broadcast %19 : vector<1x32xf32> to vector<16x32xf32>
    %21 = arith.mulf %18, %20 : vector<16x32xf32>
    %c0_7 = arith.constant 0 : index
    %c0_8 = arith.constant 0 : index
    %22 = vector.load %arg3[%c0_7, %c0_8] : memref<1x32xf32, #tpu.memory_space<vmem>>, vector<1x32xf32>
    %23 = vector.broadcast %22 : vector<1x32xf32> to vector<16x32xf32>
    %24 = arith.addf %21, %23 : vector<16x32xf32>
    %c0_9 = arith.constant 0 : index
    %c0_10 = arith.constant 0 : index
    %25 = vector.load %arg4[%c0_9, %c0_10] : memref<16x32xf32, #tpu.memory_space<vmem>>, vector<16x32xf32>
    tpu.vector_store %arg4[%c0_9, %c0_10], %24 {strides = array<i32>} : memref<16x32xf32, #tpu.memory_space<vmem>>, vector<16x32xf32>,
    return
  }
  func.func @transform_0(%arg0: i32) -> (i32, i32) {
    %c0_i32 = arith.constant 0 : i32
    %c0_i32_0 = arith.constant 0 : i32
    return %arg0, %c0_i32 : i32, i32
  }
  func.func @transform_1(%arg0: i32) -> (i32, i32) {
    %c0_i32 = arith.constant 0 : i32
    %c0_i32_0 = arith.constant 0 : i32
    %c0_i32_1 = arith.constant 0 : i32
    return %c0_i32, %c0_i32_0 : i32, i32
  }
  func.func @transform_2(%arg0: i32) -> (i32, i32) {
    %c0_i32 = arith.constant 0 : i32
    %c0_i32_0 = arith.constant 0 : i32
    %c0_i32_1 = arith.constant 0 : i32
    return %c0_i32, %c0_i32_0 : i32, i32
  }
  func.func @transform_3(%arg0: i32) -> (i32, i32) {
    %c0_i32 = arith.constant 0 : i32
    %c0_i32_0 = arith.constant 0 : i32
    return %arg0, %c0_i32 : i32, i32
  }
}

module attributes {stable_mosaic.version = 11 : i64} {
  func.func @_attention_kernel_probs(%arg0: i32, %arg1: memref<1x4x8x8xf32, #tpu.memory_space<vmem>>, %arg2: memref<1x4x8x8xf32, #tpu.memory_space<vmem>>, %arg3: memref<1x4x8x8xf32, #tpu.memory_space<vmem>>, %arg4: memref<1x1x8xf32, #tpu.memory_space<vmem>>, %arg5: memref<1x4x8x8xf32, #tpu.memory_space<vmem>>, %arg6: memref<1x4x8x8xf32, #tpu.memory_space<vmem>>) attributes {dimension_semantics = [#tpu.dimension_semantics<parallel>], iteration_bounds = array<i64: 2>, scalar_prefetch = 0 : i64, scratch_operands = 0 : i64, tpu.core_type = #tpu.core_type<tc>, window_params = [{transform_indices = @transform_0, window_bounds = array<i64: 1, 4, 8, 8>}, {transform_indices = @transform_1, window_bounds = array<i64: 1, 4, 8, 8>}, {transform_indices = @transform_2, window_bounds = array<i64: 1, 4, 8, 8>}, {transform_indices = @transform_3, window_bounds = array<i64: 1, 1, 8>}, {transform_indices = @transform_4, window_bounds = array<i64: 1, 4, 8, 8>}, {transform_indices = @transform_5, window_bounds = array<i64: 1, 4, 8, 8>}]} {
    %c0 = arith.constant 0 : index
    %c0_0 = arith.constant 0 : index
    %c0_1 = arith.constant 0 : index
    %c0_2 = arith.constant 0 : index
    %0 = vector.load %arg1[%c0, %c0_0, %c0_1, %c0_2] : memref<1x4x8x8xf32, #tpu.memory_space<vmem>>, vector<1x4x8x8xf32>
    %1 = vector.shape_cast %0 : vector<1x4x8x8xf32> to vector<4x8x8xf32>
    %c0_3 = arith.constant 0 : index
    %c0_4 = arith.constant 0 : index
    %c0_5 = arith.constant 0 : index
    %c0_6 = arith.constant 0 : index
    %2 = vector.load %arg2[%c0_3, %c0_4, %c0_5, %c0_6] : memref<1x4x8x8xf32, #tpu.memory_space<vmem>>, vector<1x4x8x8xf32>
    %3 = vector.shape_cast %2 : vector<1x4x8x8xf32> to vector<4x8x8xf32>
    %c0_7 = arith.constant 0 : index
    %c0_8 = arith.constant 0 : index
    %c0_9 = arith.constant 0 : index
    %c0_10 = arith.constant 0 : index
    %4 = vector.load %arg3[%c0_7, %c0_8, %c0_9, %c0_10] : memref<1x4x8x8xf32, #tpu.memory_space<vmem>>, vector<1x4x8x8xf32>
    %5 = vector.shape_cast %4 : vector<1x4x8x8xf32> to vector<4x8x8xf32>
    %cst = arith.constant dense<0.000000e+00> : vector<4x8x8xf32>
    %6 = tpu.matmul %1, %3, %cst {dimension_numbers = #tpu.dot_dimension_numbers<[2], [2], [1], [1], [0, 0, 0, 1, 1, 1], [0], [0]>} : vector<4x8x8xf32>, vector<4x8x8xf32>, vector<4x8x8xf32> -> vector<4x8x8xf32>
    %cst_11 = arith.constant 0.353553385 : f32
    %7 = vector.broadcast %cst_11 : f32 to vector<4x8x8xf32>
    %8 = arith.mulf %6, %7 : vector<4x8x8xf32>
    %c0_12 = arith.constant 0 : index
    %c0_13 = arith.constant 0 : index
    %c0_14 = arith.constant 0 : index
    %9 = vector.load %arg4[%c0_12, %c0_13, %c0_14] : memref<1x1x8xf32, #tpu.memory_space<vmem>>, vector<1x1x8xf32>
    %10 = vector.shape_cast %9 : vector<1x1x8xf32> to vector<1x8xf32>
    %11 = vector.shape_cast %10 : vector<1x8xf32> to vector<1x1x8xf32>
    %12 = vector.broadcast %11 : vector<1x1x8xf32> to vector<4x8x8xf32>
    %13 = arith.addf %8, %12 : vector<4x8x8xf32>
    %cst_15 = arith.constant dense<0xFF800000> : vector<4x8xf32>
    %14 = vector.multi_reduction <maximumf>, %13, %cst_15 [2] : vector<4x8x8xf32> to vector<4x8xf32>
    %15 = vector.shape_cast %14 : vector<4x8xf32> to vector<4x8x1xf32>
    %16 = vector.broadcast %15 : vector<4x8x1xf32> to vector<4x8x8xf32>
    %17 = arith.subf %13, %16 : vector<4x8x8xf32>
    %18 = math.exp %17 : vector<4x8x8xf32>
    %cst_16 = arith.constant dense<0.000000e+00> : vector<4x8xf32>
    %19 = vector.multi_reduction <add>, %18, %cst_16 [2] : vector<4x8x8xf32> to vector<4x8xf32>
    %20 = vector.shape_cast %19 : vector<4x8xf32> to vector<4x8x1xf32>
    %21 = vector.broadcast %20 : vector<4x8x1xf32> to vector<4x8x8xf32>
    %22 = arith.divf %18, %21 : vector<4x8x8xf32>
    %c0_17 = arith.constant 0 : index
    %c0_18 = arith.constant 0 : index
    %c0_19 = arith.constant 0 : index
    %c0_20 = arith.constant 0 : index
    %23 = vector.load %arg6[%c0_17, %c0_18, %c0_19, %c0_20] : memref<1x4x8x8xf32, #tpu.memory_space<vmem>>, vector<1x4x8x8xf32>
    %24 = vector.shape_cast %23 : vector<1x4x8x8xf32> to vector<4x8x8xf32>
    %25 = vector.shape_cast %22 : vector<4x8x8xf32> to vector<1x4x8x8xf32>
    tpu.vector_store %arg6[%c0_17, %c0_18, %c0_19, %c0_20], %25 {strides = array<i32>} : memref<1x4x8x8xf32, #tpu.memory_space<vmem>>, vector<1x4x8x8xf32>,
    %cst_21 = arith.constant dense<0.000000e+00> : vector<4x8x8xf32>
    %26 = tpu.matmul %22, %5, %cst_21 {dimension_numbers = #tpu.dot_dimension_numbers<[2], [1], [1], [2], [0, 0, 0, 1, 1, 2], [0], [0]>} : vector<4x8x8xf32>, vector<4x8x8xf32>, vector<4x8x8xf32> -> vector<4x8x8xf32>
    %c0_22 = arith.constant 0 : index
    %c0_23 = arith.constant 0 : index
    %c0_24 = arith.constant 0 : index
    %c0_25 = arith.constant 0 : index
    %27 = vector.load %arg5[%c0_22, %c0_23, %c0_24, %c0_25] : memref<1x4x8x8xf32, #tpu.memory_space<vmem>>, vector<1x4x8x8xf32>
    %28 = vector.shape_cast %27 : vector<1x4x8x8xf32> to vector<4x8x8xf32>
    %29 = vector.shape_cast %26 : vector<4x8x8xf32> to vector<1x4x8x8xf32>
    tpu.vector_store %arg5[%c0_22, %c0_23, %c0_24, %c0_25], %29 {strides = array<i32>} : memref<1x4x8x8xf32, #tpu.memory_space<vmem>>, vector<1x4x8x8xf32>,
    return
  }
  func.func @transform_0(%arg0: i32) -> (i32, i32, i32, i32) {
    %c0_i32 = arith.constant 0 : i32
    %c0_i32_0 = arith.constant 0 : i32
    %c0_i32_1 = arith.constant 0 : i32
    %c0_i32_2 = arith.constant 0 : i32
    return %arg0, %c0_i32, %c0_i32_0, %c0_i32_1 : i32, i32, i32, i32
  }
  func.func @transform_1(%arg0: i32) -> (i32, i32, i32, i32) {
    %c0_i32 = arith.constant 0 : i32
    %c0_i32_0 = arith.constant 0 : i32
    %c0_i32_1 = arith.constant 0 : i32
    %c0_i32_2 = arith.constant 0 : i32
    return %arg0, %c0_i32, %c0_i32_0, %c0_i32_1 : i32, i32, i32, i32
  }
  func.func @transform_2(%arg0: i32) -> (i32, i32, i32, i32) {
    %c0_i32 = arith.constant 0 : i32
    %c0_i32_0 = arith.constant 0 : i32
    %c0_i32_1 = arith.constant 0 : i32
    %c0_i32_2 = arith.constant 0 : i32
    return %arg0, %c0_i32, %c0_i32_0, %c0_i32_1 : i32, i32, i32, i32
  }
  func.func @transform_3(%arg0: i32) -> (i32, i32, i32) {
    %c0_i32 = arith.constant 0 : i32
    %c0_i32_0 = arith.constant 0 : i32
    %c0_i32_1 = arith.constant 0 : i32
    return %arg0, %c0_i32, %c0_i32_0 : i32, i32, i32
  }
  func.func @transform_4(%arg0: i32) -> (i32, i32, i32, i32) {
    %c0_i32 = arith.constant 0 : i32
    %c0_i32_0 = arith.constant 0 : i32
    %c0_i32_1 = arith.constant 0 : i32
    %c0_i32_2 = arith.constant 0 : i32
    return %arg0, %c0_i32, %c0_i32_0, %c0_i32_1 : i32, i32, i32, i32
  }
  func.func @transform_5(%arg0: i32) -> (i32, i32, i32, i32) {
    %c0_i32 = arith.constant 0 : i32
    %c0_i32_0 = arith.constant 0 : i32
    %c0_i32_1 = arith.constant 0 : i32
    %c0_i32_2 = arith.constant 0 : i32
    return %arg0, %c0_i32, %c0_i32_0, %c0_i32_1 : i32, i32, i32, i32
  }
}

module attributes {stable_mosaic.version = 11 : i64} {
  func.func @_linear_kernel(%arg0: i32, %arg1: i32, %arg2: i32, %arg3: memref<16x32xf32, #tpu.memory_space<vmem>>, %arg4: memref<32x32xf32, #tpu.memory_space<vmem>>, %arg5: memref<1x32xf32, #tpu.memory_space<vmem>>, %arg6: memref<16x32xf32, #tpu.memory_space<vmem>>, %arg7: memref<16x32xf32, #tpu.memory_space<vmem>>) attributes {dimension_semantics = [#tpu.dimension_semantics<parallel>, #tpu.dimension_semantics<parallel>, #tpu.dimension_semantics<arbitrary>], iteration_bounds = array<i64: 1, 1, 1>, scalar_prefetch = 0 : i64, scratch_operands = 1 : i64, tpu.core_type = #tpu.core_type<tc>, window_params = [{transform_indices = @transform_0, window_bounds = array<i64: 16, 32>}, {transform_indices = @transform_1, window_bounds = array<i64: 32, 32>}, {transform_indices = @transform_2, window_bounds = array<i64: 1, 32>}, {transform_indices = @transform_3, window_bounds = array<i64: 16, 32>}]} {
    %c0_i32 = arith.constant 0 : i32
    %0 = arith.cmpi eq, %arg2, %c0_i32 : i32
    %1 = arith.extui %0 : i1 to i32
    %c0_i32_0 = arith.constant 0 : i32
    %2 = arith.cmpi ne, %1, %c0_i32_0 : i32
    scf.if %2 {
      %cst_10 = arith.constant 0.000000e+00 : f32
      %12 = vector.broadcast %cst_10 : f32 to vector<16x32xf32>
      %c0_11 = arith.constant 0 : index
      %c0_12 = arith.constant 0 : index
      %13 = vector.load %arg7[%c0_11, %c0_12] : memref<16x32xf32, #tpu.memory_space<vmem>>, vector<16x32xf32>
      tpu.vector_store %arg7[%c0_11, %c0_12], %12 {strides = array<i32>} : memref<16x32xf32, #tpu.memory_space<vmem>>, vector<16x32xf32>,
    } else {
    }
    %c0 = arith.constant 0 : index
    %c0_1 = arith.constant 0 : index
    %3 = vector.load %arg3[%c0, %c0_1] : memref<16x32xf32, #tpu.memory_space<vmem>>, vector<16x32xf32>
    %c0_2 = arith.constant 0 : index
    %c0_3 = arith.constant 0 : index
    %4 = vector.load %arg4[%c0_2, %c0_3] : memref<32x32xf32, #tpu.memory_space<vmem>>, vector<32x32xf32>
    %c0_4 = arith.constant 0 : index
    %c0_5 = arith.constant 0 : index
    %5 = vector.load %arg7[%c0_4, %c0_5] : memref<16x32xf32, #tpu.memory_space<vmem>>, vector<16x32xf32>
    %cst = arith.constant dense<0.000000e+00> : vector<16x32xf32>
    %6 = tpu.matmul %3, %4, %cst {dimension_numbers = #tpu.dot_dimension_numbers<[1], [0], [0], [1], [0, 0, 1, 1], [], []>} : vector<16x32xf32>, vector<32x32xf32>, vector<16x32xf32> -> vector<16x32xf32>
    %7 = arith.addf %5, %6 : vector<16x32xf32>
    %c0_6 = arith.constant 0 : index
    %c0_7 = arith.constant 0 : index
    %8 = vector.load %arg7[%c0_6, %c0_7] : memref<16x32xf32, #tpu.memory_space<vmem>>, vector<16x32xf32>
    tpu.vector_store %arg7[%c0_6, %c0_7], %7 {strides = array<i32>} : memref<16x32xf32, #tpu.memory_space<vmem>>, vector<16x32xf32>,
    %c0_i32_8 = arith.constant 0 : i32
    %9 = arith.cmpi eq, %arg2, %c0_i32_8 : i32
    %10 = arith.extui %9 : i1 to i32
    %c0_i32_9 = arith.constant 0 : i32
    %11 = arith.cmpi ne, %10, %c0_i32_9 : i32
    scf.if %11 {
      %c0_10 = arith.constant 0 : index
      %c0_11 = arith.constant 0 : index
      %12 = vector.load %arg7[%c0_10, %c0_11] : memref<16x32xf32, #tpu.memory_space<vmem>>, vector<16x32xf32>
      %c0_12 = arith.constant 0 : index
      %c0_13 = arith.constant 0 : index
      %13 = vector.load %arg5[%c0_12, %c0_13] : memref<1x32xf32, #tpu.memory_space<vmem>>, vector<1x32xf32>
      %14 = vector.broadcast %13 : vector<1x32xf32> to vector<16x32xf32>
      %15 = arith.addf %12, %14 : vector<16x32xf32>
      %c0_14 = arith.constant 0 : index
      %c0_15 = arith.constant 0 : index
      %16 = vector.load %arg6[%c0_14, %c0_15] : memref<16x32xf32, #tpu.memory_space<vmem>>, vector<16x32xf32>
      tpu.vector_store %arg6[%c0_14, %c0_15], %15 {strides = array<i32>} : memref<16x32xf32, #tpu.memory_space<vmem>>, vector<16x32xf32>,
    } else {
    }
    return
  }
  func.func @transform_0(%arg0: i32, %arg1: i32, %arg2: i32) -> (i32, i32) {
    %c0_i32 = arith.constant 0 : i32
    return %arg0, %arg2 : i32, i32
  }
  func.func @transform_1(%arg0: i32, %arg1: i32, %arg2: i32) -> (i32, i32) {
    %c0_i32 = arith.constant 0 : i32
    return %arg2, %arg1 : i32, i32
  }
  func.func @transform_2(%arg0: i32, %arg1: i32, %arg2: i32) -> (i32, i32) {
    %c0_i32 = arith.constant 0 : i32
    %c0_i32_0 = arith.constant 0 : i32
    return %c0_i32, %arg1 : i32, i32
  }
  func.func @transform_3(%arg0: i32, %arg1: i32, %arg2: i32) -> (i32, i32) {
    %c0_i32 = arith.constant 0 : i32
    return %arg0, %arg1 : i32, i32
  }
}

module attributes {stable_mosaic.version = 11 : i64} {
  func.func @_linear_kernel(%arg0: i32, %arg1: i32, %arg2: i32, %arg3: memref<16x32xf32, #tpu.memory_space<vmem>>, %arg4: memref<32x64xf32, #tpu.memory_space<vmem>>, %arg5: memref<1x64xf32, #tpu.memory_space<vmem>>, %arg6: memref<16x64xf32, #tpu.memory_space<vmem>>, %arg7: memref<16x64xf32, #tpu.memory_space<vmem>>) attributes {dimension_semantics = [#tpu.dimension_semantics<parallel>, #tpu.dimension_semantics<parallel>, #tpu.dimension_semantics<arbitrary>], iteration_bounds = array<i64: 1, 1, 1>, scalar_prefetch = 0 : i64, scratch_operands = 1 : i64, tpu.core_type = #tpu.core_type<tc>, window_params = [{transform_indices = @transform_0, window_bounds = array<i64: 16, 32>}, {transform_indices = @transform_1, window_bounds = array<i64: 32, 64>}, {transform_indices = @transform_2, window_bounds = array<i64: 1, 64>}, {transform_indices = @transform_3, window_bounds = array<i64: 16, 64>}]} {
    %c0_i32 = arith.constant 0 : i32
    %0 = arith.cmpi eq, %arg2, %c0_i32 : i32
    %1 = arith.extui %0 : i1 to i32
    %c0_i32_0 = arith.constant 0 : i32
    %2 = arith.cmpi ne, %1, %c0_i32_0 : i32
    scf.if %2 {
      %cst_10 = arith.constant 0.000000e+00 : f32
      %12 = vector.broadcast %cst_10 : f32 to vector<16x64xf32>
      %c0_11 = arith.constant 0 : index
      %c0_12 = arith.constant 0 : index
      %13 = vector.load %arg7[%c0_11, %c0_12] : memref<16x64xf32, #tpu.memory_space<vmem>>, vector<16x64xf32>
      tpu.vector_store %arg7[%c0_11, %c0_12], %12 {strides = array<i32>} : memref<16x64xf32, #tpu.memory_space<vmem>>, vector<16x64xf32>,
    } else {
    }
    %c0 = arith.constant 0 : index
    %c0_1 = arith.constant 0 : index
    %3 = vector.load %arg3[%c0, %c0_1] : memref<16x32xf32, #tpu.memory_space<vmem>>, vector<16x32xf32>
    %c0_2 = arith.constant 0 : index
    %c0_3 = arith.constant 0 : index
    %4 = vector.load %arg4[%c0_2, %c0_3] : memref<32x64xf32, #tpu.memory_space<vmem>>, vector<32x64xf32>
    %c0_4 = arith.constant 0 : index
    %c0_5 = arith.constant 0 : index
    %5 = vector.load %arg7[%c0_4, %c0_5] : memref<16x64xf32, #tpu.memory_space<vmem>>, vector<16x64xf32>
    %cst = arith.constant dense<0.000000e+00> : vector<16x64xf32>
    %6 = tpu.matmul %3, %4, %cst {dimension_numbers = #tpu.dot_dimension_numbers<[1], [0], [0], [1], [0, 0, 1, 1], [], []>} : vector<16x32xf32>, vector<32x64xf32>, vector<16x64xf32> -> vector<16x64xf32>
    %7 = arith.addf %5, %6 : vector<16x64xf32>
    %c0_6 = arith.constant 0 : index
    %c0_7 = arith.constant 0 : index
    %8 = vector.load %arg7[%c0_6, %c0_7] : memref<16x64xf32, #tpu.memory_space<vmem>>, vector<16x64xf32>
    tpu.vector_store %arg7[%c0_6, %c0_7], %7 {strides = array<i32>} : memref<16x64xf32, #tpu.memory_space<vmem>>, vector<16x64xf32>,
    %c0_i32_8 = arith.constant 0 : i32
    %9 = arith.cmpi eq, %arg2, %c0_i32_8 : i32
    %10 = arith.extui %9 : i1 to i32
    %c0_i32_9 = arith.constant 0 : i32
    %11 = arith.cmpi ne, %10, %c0_i32_9 : i32
    scf.if %11 {
      %c0_10 = arith.constant 0 : index
      %c0_11 = arith.constant 0 : index
      %12 = vector.load %arg7[%c0_10, %c0_11] : memref<16x64xf32, #tpu.memory_space<vmem>>, vector<16x64xf32>
      %c0_12 = arith.constant 0 : index
      %c0_13 = arith.constant 0 : index
      %13 = vector.load %arg5[%c0_12, %c0_13] : memref<1x64xf32, #tpu.memory_space<vmem>>, vector<1x64xf32>
      %14 = vector.broadcast %13 : vector<1x64xf32> to vector<16x64xf32>
      %15 = arith.addf %12, %14 : vector<16x64xf32>
      %cst_14 = arith.constant 5.000000e-01 : f32
      %16 = vector.broadcast %cst_14 : f32 to vector<16x64xf32>
      %17 = arith.mulf %16, %15 : vector<16x64xf32>
      %cst_15 = arith.constant 4.471500e-02 : f32
      %18 = vector.broadcast %cst_15 : f32 to vector<16x64xf32>
      %19 = arith.mulf %18, %15 : vector<16x64xf32>
      %20 = arith.mulf %19, %15 : vector<16x64xf32>
      %21 = arith.mulf %20, %15 : vector<16x64xf32>
      %22 = arith.addf %15, %21 : vector<16x64xf32>
      %cst_16 = arith.constant 0.797884583 : f32
      %23 = vector.broadcast %cst_16 : f32 to vector<16x64xf32>
      %24 = arith.mulf %23, %22 : vector<16x64xf32>
      %25 = math.tanh %24 : vector<16x64xf32>
      %cst_17 = arith.constant 1.000000e+00 : f32
      %26 = vector.broadcast %cst_17 : f32 to vector<16x64xf32>
      %27 = arith.addf %26, %25 : vector<16x64xf32>
      %28 = arith.mulf %17, %27 : vector<16x64xf32>
      %c0_18 = arith.constant 0 : index
      %c0_19 = arith.constant 0 : index
      %29 = vector.load %arg6[%c0_18, %c0_19] : memref<16x64xf32, #tpu.memory_space<vmem>>, vector<16x64xf32>
      tpu.vector_store %arg6[%c0_18, %c0_19], %28 {strides = array<i32>} : memref<16x64xf32, #tpu.memory_space<vmem>>, vector<16x64xf32>,
    } else {
    }
    return
  }
  func.func @transform_0(%arg0: i32, %arg1: i32, %arg2: i32) -> (i32, i32) {
    %c0_i32 = arith.constant 0 : i32
    return %arg0, %arg2 : i32, i32
  }
  func.func @transform_1(%arg0: i32, %arg1: i32, %arg2: i32) -> (i32, i32) {
    %c0_i32 = arith.constant 0 : i32
    return %arg2, %arg1 : i32, i32
  }
  func.func @transform_2(%arg0: i32, %arg1: i32, %arg2: i32) -> (i32, i32) {
    %c0_i32 = arith.constant 0 : i32
    %c0_i32_0 = arith.constant 0 : i32
    return %c0_i32, %arg1 : i32, i32
  }
  func.func @transform_3(%arg0: i32, %arg1: i32, %arg2: i32) -> (i32, i32) {
    %c0_i32 = arith.constant 0 : i32
    return %arg0, %arg1 : i32, i32
  }
}

module attributes {stable_mosaic.version = 11 : i64} {
  func.func @_linear_kernel(%arg0: i32, %arg1: i32, %arg2: i32, %arg3: memref<16x64xf32, #tpu.memory_space<vmem>>, %arg4: memref<64x32xf32, #tpu.memory_space<vmem>>, %arg5: memref<1x32xf32, #tpu.memory_space<vmem>>, %arg6: memref<16x32xf32, #tpu.memory_space<vmem>>, %arg7: memref<16x32xf32, #tpu.memory_space<vmem>>) attributes {dimension_semantics = [#tpu.dimension_semantics<parallel>, #tpu.dimension_semantics<parallel>, #tpu.dimension_semantics<arbitrary>], iteration_bounds = array<i64: 1, 1, 1>, scalar_prefetch = 0 : i64, scratch_operands = 1 : i64, tpu.core_type = #tpu.core_type<tc>, window_params = [{transform_indices = @transform_0, window_bounds = array<i64: 16, 64>}, {transform_indices = @transform_1, window_bounds = array<i64: 64, 32>}, {transform_indices = @transform_2, window_bounds = array<i64: 1, 32>}, {transform_indices = @transform_3, window_bounds = array<i64: 16, 32>}]} {
    %c0_i32 = arith.constant 0 : i32
    %0 = arith.cmpi eq, %arg2, %c0_i32 : i32
    %1 = arith.extui %0 : i1 to i32
    %c0_i32_0 = arith.constant 0 : i32
    %2 = arith.cmpi ne, %1, %c0_i32_0 : i32
    scf.if %2 {
      %cst_10 = arith.constant 0.000000e+00 : f32
      %12 = vector.broadcast %cst_10 : f32 to vector<16x32xf32>
      %c0_11 = arith.constant 0 : index
      %c0_12 = arith.constant 0 : index
      %13 = vector.load %arg7[%c0_11, %c0_12] : memref<16x32xf32, #tpu.memory_space<vmem>>, vector<16x32xf32>
      tpu.vector_store %arg7[%c0_11, %c0_12], %12 {strides = array<i32>} : memref<16x32xf32, #tpu.memory_space<vmem>>, vector<16x32xf32>,
    } else {
    }
    %c0 = arith.constant 0 : index
    %c0_1 = arith.constant 0 : index
    %3 = vector.load %arg3[%c0, %c0_1] : memref<16x64xf32, #tpu.memory_space<vmem>>, vector<16x64xf32>
    %c0_2 = arith.constant 0 : index
    %c0_3 = arith.constant 0 : index
    %4 = vector.load %arg4[%c0_2, %c0_3] : memref<64x32xf32, #tpu.memory_space<vmem>>, vector<64x32xf32>
    %c0_4 = arith.constant 0 : index
    %c0_5 = arith.constant 0 : index
    %5 = vector.load %arg7[%c0_4, %c0_5] : memref<16x32xf32, #tpu.memory_space<vmem>>, vector<16x32xf32>
    %cst = arith.constant dense<0.000000e+00> : vector<16x32xf32>
    %6 = tpu.matmul %3, %4, %cst {dimension_numbers = #tpu.dot_dimension_numbers<[1], [0], [0], [1], [0, 0, 1, 1], [], []>} : vector<16x64xf32>, vector<64x32xf32>, vector<16x32xf32> -> vector<16x32xf32>
    %7 = arith.addf %5, %6 : vector<16x32xf32>
    %c0_6 = arith.constant 0 : index
    %c0_7 = arith.constant 0 : index
    %8 = vector.load %arg7[%c0_6, %c0_7] : memref<16x32xf32, #tpu.memory_space<vmem>>, vector<16x32xf32>
    tpu.vector_store %arg7[%c0_6, %c0_7], %7 {strides = array<i32>} : memref<16x32xf32, #tpu.memory_space<vmem>>, vector<16x32xf32>,
    %c0_i32_8 = arith.constant 0 : i32
    %9 = arith.cmpi eq, %arg2, %c0_i32_8 : i32
    %10 = arith.extui %9 : i1 to i32
    %c0_i32_9 = arith.constant 0 : i32
    %11 = arith.cmpi ne, %10, %c0_i32_9 : i32
    scf.if %11 {
      %c0_10 = arith.constant 0 : index
      %c0_11 = arith.constant 0 : index
      %12 = vector.load %arg7[%c0_10, %c0_11] : memref<16x32xf32, #tpu.memory_space<vmem>>, vector<16x32xf32>
      %c0_12 = arith.constant 0 : index
      %c0_13 = arith.constant 0 : index
      %13 = vector.load %arg5[%c0_12, %c0_13] : memref<1x32xf32, #tpu.memory_space<vmem>>, vector<1x32xf32>
      %14 = vector.broadcast %13 : vector<1x32xf32> to vector<16x32xf32>
      %15 = arith.addf %12, %14 : vector<16x32xf32>
      %c0_14 = arith.constant 0 : index
      %c0_15 = arith.constant 0 : index
      %16 = vector.load %arg6[%c0_14, %c0_15] : memref<16x32xf32, #tpu.memory_space<vmem>>, vector<16x32xf32>
      tpu.vector_store %arg6[%c0_14, %c0_15], %15 {strides = array<i32>} : memref<16x32xf32, #tpu.memory_space<vmem>>, vector<16x32xf32>,
    } else {
    }
    return
  }
  func.func @transform_0(%arg0: i32, %arg1: i32, %arg2: i32) -> (i32, i32) {
    %c0_i32 = arith.constant 0 : i32
    return %arg0, %arg2 : i32, i32
  }
  func.func @transform_1(%arg0: i32, %arg1: i32, %arg2: i32) -> (i32, i32) {
    %c0_i32 = arith.constant 0 : i32
    return %arg2, %arg1 : i32, i32
  }
  func.func @transform_2(%arg0: i32, %arg1: i32, %arg2: i32) -> (i32, i32) {
    %c0_i32 = arith.constant 0 : i32
    %c0_i32_0 = arith.constant 0 : i32
    return %c0_i32, %arg1 : i32, i32
  }
  func.func @transform_3(%arg0: i32, %arg1: i32, %arg2: i32) -> (i32, i32) {
    %c0_i32 = arith.constant 0 : i32
    return %arg0, %arg1 : i32, i32
  }
}

module attributes {stable_mosaic.version = 11 : i64} {
  func.func @_residual_layernorm_kernel(%arg0: i32, %arg1: memref<16x32xf32, #tpu.memory_space<vmem>>, %arg2: memref<16x32xf32, #tpu.memory_space<vmem>>, %arg3: memref<1x32xf32, #tpu.memory_space<vmem>>, %arg4: memref<1x32xf32, #tpu.memory_space<vmem>>, %arg5: memref<16x32xf32, #tpu.memory_space<vmem>>) attributes {dimension_semantics = [#tpu.dimension_semantics<parallel>], iteration_bounds = array<i64: 1>, scalar_prefetch = 0 : i64, scratch_operands = 0 : i64, tpu.core_type = #tpu.core_type<tc>, window_params = [{transform_indices = @transform_0, window_bounds = array<i64: 16, 32>}, {transform_indices = @transform_1, window_bounds = array<i64: 16, 32>}, {pipeline_mode = #tpu.pipeline_mode<synchronous>, transform_indices = @transform_2, window_bounds = array<i64: 1, 32>}, {pipeline_mode = #tpu.pipeline_mode<synchronous>, transform_indices = @transform_3, window_bounds = array<i64: 1, 32>}, {transform_indices = @transform_4, window_bounds = array<i64: 16, 32>}]} {
    %c0 = arith.constant 0 : index
    %c0_0 = arith.constant 0 : index
    %0 = vector.load %arg1[%c0, %c0_0] : memref<16x32xf32, #tpu.memory_space<vmem>>, vector<16x32xf32>
    %c0_1 = arith.constant 0 : index
    %c0_2 = arith.constant 0 : index
    %1 = vector.load %arg2[%c0_1, %c0_2] : memref<16x32xf32, #tpu.memory_space<vmem>>, vector<16x32xf32>
    %2 = arith.addf %0, %1 : vector<16x32xf32>
    %cst = arith.constant dense<0.000000e+00> : vector<16xf32>
    %3 = vector.multi_reduction <add>, %2, %cst [1] : vector<16x32xf32> to vector<16xf32>
    %4 = vector.shape_cast %3 : vector<16xf32> to vector<16x1xf32>
    %cst_3 = arith.constant 3.200000e+01 : f32
    %5 = vector.broadcast %cst_3 : f32 to vector<16x1xf32>
    %6 = arith.divf %4, %5 : vector<16x1xf32>
    %7 = vector.broadcast %6 : vector<16x1xf32> to vector<16x32xf32>
    %8 = arith.subf %2, %7 : vector<16x32xf32>
    %9 = arith.mulf %8, %8 : vector<16x32xf32>
    %cst_4 = arith.constant dense<0.000000e+00> : vector<16xf32>
    %10 = vector.multi_reduction <add>, %9, %cst_4 [1] : vector<16x32xf32> to vector<16xf32>
    %11 = vector.shape_cast %10 : vector<16xf32> to vector<16x1xf32>
    %cst_5 = arith.constant 3.200000e+01 : f32
    %12 = vector.broadcast %cst_5 : f32 to vector<16x1xf32>
    %13 = arith.divf %11, %12 : vector<16x1xf32>
    %14 = vector.broadcast %6 : vector<16x1xf32> to vector<16x32xf32>
    %15 = arith.subf %2, %14 : vector<16x32xf32>
    %cst_6 = arith.constant 9.99999996E-13 : f32
    %16 = vector.broadcast %cst_6 : f32 to vector<16x1xf32>
    %17 = arith.addf %13, %16 : vector<16x1xf32>
    %18 = math.rsqrt %17 : vector<16x1xf32>
    %19 = vector.broadcast %18 : vector<16x1xf32> to vector<16x32xf32>
    %20 = arith.mulf %15, %19 : vector<16x32xf32>
    %c0_7 = arith.constant 0 : index
    %c0_8 = arith.constant 0 : index
    %21 = vector.load %arg3[%c0_7, %c0_8] : memref<1x32xf32, #tpu.memory_space<vmem>>, vector<1x32xf32>
    %22 = vector.broadcast %21 : vector<1x32xf32> to vector<16x32xf32>
    %23 = arith.mulf %20, %22 : vector<16x32xf32>
    %c0_9 = arith.constant 0 : index
    %c0_10 = arith.constant 0 : index
    %24 = vector.load %arg4[%c0_9, %c0_10] : memref<1x32xf32, #tpu.memory_space<vmem>>, vector<1x32xf32>
    %25 = vector.broadcast %24 : vector<1x32xf32> to vector<16x32xf32>
    %26 = arith.addf %23, %25 : vector<16x32xf32>
    %c0_11 = arith.constant 0 : index
    %c0_12 = arith.constant 0 : index
    %27 = vector.load %arg5[%c0_11, %c0_12] : memref<16x32xf32, #tpu.memory_space<vmem>>, vector<16x32xf32>
    tpu.vector_store %arg5[%c0_11, %c0_12], %26 {strides = array<i32>} : memref<16x32xf32, #tpu.memory_space<vmem>>, vector<16x32xf32>,
    return
  }
  func.func @transform_0(%arg0: i32) -> (i32, i32) {
    %c0_i32 = arith.constant 0 : i32
    %c0_i32_0 = arith.constant 0 : i32
    return %arg0, %c0_i32 : i32, i32
  }
  func.func @transform_1(%arg0: i32) -> (i32, i32) {
    %c0_i32 = arith.constant 0 : i32
    %c0_i32_0 = arith.constant 0 : i32
    return %arg0, %c0_i32 : i32, i32
  }
  func.func @transform_2(%arg0: i32) -> (i32, i32) {
    %c0_i32 = arith.constant 0 : i32
    %c0_i32_0 = arith.constant 0 : i32
    %c0_i32_1 = arith.constant 0 : i32
    return %c0_i32, %c0_i32_0 : i32, i32
  }
  func.func @transform_3(%arg0: i32) -> (i32, i32) {
    %c0_i32 = arith.constant 0 : i32
    %c0_i32_0 = arith.constant 0 : i32
    %c0_i32_1 = arith.constant 0 : i32
    return %c0_i32, %c0_i32_0 : i32, i32
  }
  func.func @transform_4(%arg0: i32) -> (i32, i32) {
    %c0_i32 = arith.constant 0 : i32
    %c0_i32_0 = arith.constant 0 : i32
    return %arg0, %c0_i32 : i32, i32
  }
}

</mosaic_0001>

<bundles_post_ra>
// kernel: bert_crop_forward.18
= control target key start
LH: loop header
LB: loop body
LE: loop exit
PB: predicated region body
PF: predicated region fallthrough
CT: control target
= control target key end

     0   :  { %vm18_vm0 = vcmask 261120   ;;  %v156_v2 = vmov 0.0   ;;  %s212_s1 = inlined_call_operand.vmem [shape: f32[32,32], index: 1, kind: input, shape index: {}]   ;;  %s213_s0 = inlined_call_operand.vmem [shape: f32[16,32], index: 0, kind: input, shape index: {}]   ;;  %s214_s2 = inlined_call_operand.vmem [shape: f32[1,32], index: 2, kind: input, shape index: {}]   ;;  %s215_s3 = inlined_call_operand.vmem [shape: f32[16,32], index: 3, kind: output, shape index: {}]  }
   0x1   :  { %v26_v0 = vld [vmem:[%s212_s1 + $0x18] sm:$0xff]  ;;  %v25_v1 = vld [vmem:[%s212_s1 + $0x10] sm:$0xff]  ;;  %20 = vst.msk [vmem:[#allocation2 + $0x8] sm:$0xff] %vm18_vm0, %v156_v2  ;;  %19 = vst.msk [vmem:[#allocation2] sm:$0xff] %vm18_vm0, %v156_v2 }
   0x2   :  { %144 = vmatprep.subr.mxu0 %v26_v0  ;;  %v21_v3 = vld [vmem:[%s213_s0] sm:$0xff]  ;;  %v24_v4 = vld [vmem:[%s212_s1 + $0x8] sm:$0xff] }
   0x3   :  { %145 = vmatpush3.msra.mxu0 %v26_v0  ;;  %152 = vmatprep.mubr.msk.f32.mxu0 %vm18_vm0, %v21_v3  ;;  %v23_v5 = vld [vmem:[%s212_s1] sm:$0xff]  ;;  %v22_v6 = vld [vmem:[%s213_s0 + $0x8] sm:$0xff] }
   0x4   :  { %146 = vmatprep.subr.mxu0 %v25_v1  ;;  %v137_v13 = vld [vmem:[%s214_s2] ss:$0 sm:$0xff] }
   0x5   :  { %147 = vmatpush3.msra.mxu0 %v25_v1 }
   0x6   :  { %148 = vmatprep.subr.mxu0 %v24_v4 }
   0x7   :  { %149 = vmatpush3.msra.mxu0 %v24_v4 }
   0x8   :  { %150 = vmatprep.subr.mxu0 %v23_v5  ;;  %v28_v7 = vld [vmem:[#allocation2 + $0x8] sm:$0xff]  ;;  %v27_v9 = vld [vmem:[#allocation2] sm:$0xff] }
   0x9   :  { %151 = vmatpush3.msra.mxu0 %v23_v5 }
   0xa   :  { %153 = vmatmul.mubr.msk.f32.vlgmr.msra.gmra.mxu0 %vm18_vm0, %v22_v6 }
  0xca   :  { %v154_v8 = vpop.f32.mrf.mxu0 }
  0xcb   :  { %v112_v10 = vadd.f32 %v154_v8, %v28_v7 }
  0xcc   :  { %v102_v11 = vpop.f32.mrf.mxu0 }
  0xcd   :  { %114 = vst.msk [vmem:[#allocation2 + $0x8] sm:$0xff] %vm18_vm0, %v112_v10  ;;  %v111_v12 = vadd.f32 %v102_v11, %v27_v9 }
  0xcf   :  { %113 = vst.msk [vmem:[#allocation2] sm:$0xff] %vm18_vm0, %v111_v12 }
  0xd4   :  { %v119_v14 = vld [vmem:[#allocation2 + $0x8] sm:$0xff] }
  0xd5   :  { %v128_v15 = vadd.f32 %v137_v13, %v119_v14 }
  0xd6   :  { %v118_v16 = vld [vmem:[#allocation2] sm:$0xff] }
  0xd7   :  { %130 = vst.msk [vmem:[%s215_s3 + $0x8] sm:$0xff] %vm18_vm0, %v128_v15  ;;  %v127_v17 = vadd.f32 %v137_v13, %v118_v16 }
  0xd9   :  { %129 = vst.msk [vmem:[%s215_s3] sm:$0xff] %vm18_vm0, %v127_v17 }

// kernel: bert_crop_forward.16
= control target key start
LH: loop header
LB: loop body
LE: loop exit
PB: predicated region body
PF: predicated region fallthrough
CT: control target
= control target key end

     0   :  { %vm29_vm0 = vcmask 261120   ;;  %vm18_vm1 = vcmask 785408   ;;  %v157_v2 = vmov 0.0   ;;  %s213_s1 = inlined_call_operand.vmem [shape: f32[32,96], index: 1, kind: input, shape index: {}]   ;;  %s214_s0 = inlined_call_operand.vmem [shape: f32[16,32], index: 0, kind: input, shape index: {}]   ;;  %s215_s2 = inlined_call_operand.vmem [shape: f32[1,96], index: 2, kind: input, shape index: {}]   ;;  %s216_s3 = inlined_call_operand.vmem [shape: f32[16,96], index: 3, kind: output, shape index: {}]  }
   0x1   :  { %v26_v0 = vld [vmem:[%s213_s1 + $0x18] sm:$0xff]  ;;  %v25_v1 = vld [vmem:[%s213_s1 + $0x10] sm:$0xff]  ;;  %20 = vst.msk [vmem:[#allocation2 + $0x8] sm:$0xff] %vm18_vm1, %v157_v2  ;;  %19 = vst.msk [vmem:[#allocation2] sm:$0xff] %vm18_vm1, %v157_v2 }
   0x2   :  { %145 = vmatprep.subr.mxu0 %v26_v0  ;;  %v21_v3 = vld [vmem:[%s214_s0] sm:$0xff]  ;;  %v24_v4 = vld [vmem:[%s213_s1 + $0x8] sm:$0xff] }
   0x3   :  { %146 = vmatpush3.msra.mxu0 %v26_v0  ;;  %153 = vmatprep.mubr.msk.f32.mxu0 %vm29_vm0, %v21_v3  ;;  %v23_v5 = vld [vmem:[%s213_s1] sm:$0xff]  ;;  %v22_v6 = vld [vmem:[%s214_s0 + $0x8] sm:$0xff] }
   0x4   :  { %147 = vmatprep.subr.mxu0 %v25_v1  ;;  %v138_v13 = vld [vmem:[%s215_s2] ss:$0 sm:$0xff] }
   0x5   :  { %148 = vmatpush3.msra.mxu0 %v25_v1 }
   0x6   :  { %149 = vmatprep.subr.mxu0 %v24_v4 }
   0x7   :  { %150 = vmatpush3.msra.mxu0 %v24_v4 }
   0x8   :  { %151 = vmatprep.subr.mxu0 %v23_v5  ;;  %v28_v7 = vld [vmem:[#allocation2 + $0x8] sm:$0xff]  ;;  %v27_v9 = vld [vmem:[#allocation2] sm:$0xff] }
   0x9   :  { %152 = vmatpush3.msra.mxu0 %v23_v5 }
   0xa   :  { %154 = vmatmul.mubr.msk.f32.vlgmr.msra.gmra.mxu0 %vm29_vm0, %v22_v6 }
  0xca   :  { %v155_v8 = vpop.f32.mrf.mxu0 }
  0xcb   :  { %v112_v10 = vadd.f32 %v155_v8, %v28_v7 }
  0xcc   :  { %v102_v11 = vpop.f32.mrf.mxu0 }
  0xcd   :  { %115 = vst.msk [vmem:[#allocation2 + $0x8] sm:$0xff] %vm18_vm1, %v112_v10  ;;  %v111_v12 = vadd.f32 %v102_v11, %v27_v9 }
  0xcf   :  { %114 = vst.msk [vmem:[#allocation2] sm:$0xff] %vm18_vm1, %v111_v12 }
  0xd4   :  { %v120_v14 = vld [vmem:[#allocation2 + $0x8] sm:$0xff] }
  0xd5   :  { %v129_v15 = vadd.f32 %v138_v13, %v120_v14 }
  0xd6   :  { %v119_v16 = vld [vmem:[#allocation2] sm:$0xff] }
  0xd7   :  { %131 = vst.msk [vmem:[%s216_s3 + $0x8] sm:$0xff] %vm18_vm1, %v129_v15  ;;  %v128_v17 = vadd.f32 %v138_v13, %v119_v16 }
  0xd9   :  { %130 = vst.msk [vmem:[%s216_s3] sm:$0xff] %vm18_vm1, %v128_v17 }

// kernel: bert_crop_forward.15
= control target key start
LH: loop header
LB: loop body
LE: loop exit
PB: predicated region body
PF: predicated region fallthrough
CT: control target
= control target key end

     0   :  { %vm16_vm0 = vcmask 261120   ;;  %s118_s0 = inlined_call_operand.vmem [shape: f32[16,32], index: 0, kind: input, shape index: {}]   ;;  %s119_s1 = inlined_call_operand.vmem [shape: f32[1,32], index: 1, kind: input, shape index: {}]   ;;  %s120_s2 = inlined_call_operand.vmem [shape: f32[1,32], index: 2, kind: input, shape index: {}]   ;;  %s121_s3 = inlined_call_operand.vmem [shape: f32[16,32], index: 3, kind: output, shape index: {}]  }
   0x1   :  { %v14_v0 = vld [vmem:[%s118_s0] sm:$0xff]  ;;  %v15_v1 = vld [vmem:[%s118_s0 + $0x8] sm:$0xff] }
   0x2   :  { %v17_v2 = vsel %vm16_vm0, %v14_v0, 0.0  ;;  %v20_v3 = vsel %vm16_vm0, %v15_v1, 0.0  ;;  %v68_v21 = vld [vmem:[%s119_s1] ss:$0 sm:$0xff] }
   0x3   :  { %18 = vadd.xlane.f32.xlu0 %v17_v2  ;;  %v69_v23 = vld [vmem:[%s120_s2] ss:$0 sm:$0xff] }
   0x7   :  { %21 = vadd.xlane.f32.xlu0 %v20_v3 }
  0x8c   :  { %v19_v4 = vpop.xlane.xlu0 %18 }
  0x8d   :  { %v24_v5 = vmul.f32 0.03125, %v19_v4 }
  0x8f   :  { %v26_v6 = vsub.f32 %v14_v0, %v24_v5 }
  0x90   :  { %v22_v7 = vpop.xlane.xlu0 %21 }
  0x91   :  { %v25_v8 = vmul.f32 0.03125, %v22_v7  ;;  %v28_v9 = vmul.f32 %v26_v6, %v26_v6 }
  0x93   :  { %v27_v10 = vsub.f32 %v15_v1, %v25_v8  ;;  %v30_v11 = vsel %vm16_vm0, %v28_v9, 0.0 }
  0x94   :  { %31 = vadd.xlane.f32.xlu1 %v30_v11 }
  0x95   :  { %v29_v12 = vmul.f32 %v27_v10, %v27_v10 }
  0x97   :  { %v33_v13 = vsel %vm16_vm0, %v29_v12, 0.0 }
  0x98   :  { %34 = vadd.xlane.f32.xlu1 %v33_v13 }
 0x11d   :  { %v32_v14 = vpop.xlane.xlu1 %31 }
 0x11e   :  { %v36_v15 = vmul.f32 0.03125, %v32_v14 }
 0x120   :  { %v38_v16 = vadd.f32 1e-12, %v36_v15 }
 0x121   :  { %v35_v17 = vpop.xlane.xlu1 %34 }
 0x122   :  { %70 = vrsqrt.f32 %v38_v16  ;;  %v37_v18 = vmul.f32 0.03125, %v35_v17 }
 0x124   :  { %v39_v19 = vadd.f32 1e-12, %v37_v18 }
 0x126   :  { %72 = vrsqrt.f32 %v39_v19 }
 0x12f   :  { %v71_v20 = vpop.eup %70 }
 0x130   :  { %v42_v22 = vmul.f32 %v71_v20, %v26_v6 }
 0x132   :  { %v51_v24 = vmul.f32 %v68_v21, %v42_v22 }
 0x133   :  { %v73_v25 = vpop.eup %72 }
 0x134   :  { %v60_v26 = vadd.f32 %v69_v23, %v51_v24  ;;  %v43_v27 = vmul.f32 %v73_v25, %v27_v10 }
 0x136   :  { %62 = vst.msk [vmem:[%s121_s3] sm:$0xff] %vm16_vm0, %v60_v26  ;;  %v52_v28 = vmul.f32 %v68_v21, %v43_v27 }
 0x138   :  { %v61_v29 = vadd.f32 %v69_v23, %v52_v28 }
 0x13a   :  { %63 = vst.msk [vmem:[%s121_s3 + $0x8] sm:$0xff] %vm16_vm0, %v61_v29 }

// kernel: bert_crop_forward.17
= control target key start
LH: loop header
LB: loop body
LE: loop exit
PB: predicated region body
PF: predicated region fallthrough
CT: control target
= control target key end

     0   :  { %11 = vsyncpa [#allocation3], 0  ;;  %s1536_s0 = inlined_call_operand.vmem [shape: f32[2,4,8,8], index: 0, kind: input, shape index: {}]   ;;  %s1537_s1 = inlined_call_operand.vmem [shape: f32[2,4,8,8], index: 1, kind: input, shape index: {}]   ;;  %s1538_s2 = inlined_call_operand.vmem [shape: f32[2,4,8,8], index: 2, kind: input, shape index: {}]   ;;  %s1539_s3 = inlined_call_operand.vmem [shape: f32[2,1,8], index: 3, kind: input, shape index: {}]   ;;  %s1540_s4 = inlined_call_operand.vmem [shape: f32[2,4,8,8], index: 4, kind: output, shape index: {0}]   ;;  %s1541_s5 = inlined_call_operand.hbm [shape: f32[2,4,8,8], index: 5, kind: output, shape index: {1}]  }
   0x1   :  { %13 = vsyncpa [#allocation3 + $0x1], 0  ;;  %s1356_s18 = smov 0   ;;  %s1358_s19 = smov 0  }
   0x2   :  { %s1360_s20 = smov 0   ;;  %s1362_s21 = smov 0  }
   0x3 LB: > { %s1377_s22 = sadd.s32 4294967295, %s1319_s21   ;;  %s1108_s23 = sadd.s32 4294967294, %s1319_s21   ;;  %s1319_s21 = sphi %s1362_s21, %s1547_s21   ;;  %s1315_s20 = sphi %s1360_s20, %s1546_s20   ;;  %s1311_s19 = sphi %s1358_s19, %s1545_s19   ;;  %s1307_s18 = sphi %s1356_s18, %s1544_s18  }
   0x4   : > { %s1381_s24 = sadd.s32 1, %s1319_s21   ;;  %s156_s25 = sadd.s32 1, %s1315_s20 }
   0x5   : > { %s153_s26 = ssub.s32 %s1319_s21, %s1381_s24  ;;  %p166_p0 = scmp.ne.s32.totalorder %s1315_s20, %s1311_s19 }
   0x6   : > { %p154_p1 = scmp.eq.s32.totalorder %s153_s26, 0  ;;  %p167_p2 = scmp.eq.s32.totalorder %s1377_s22, 1 }
   0x7   : > { %p172_p3 = scmp.ne.s32.totalorder %s1311_s19, %s1307_s18  ;;  %p173_p4 = scmp.eq.s32.totalorder %s1108_s23, 1 }
   0x8   : > { %s1392_s27 = scalar_select %p154_p1, %s1315_s20, %s156_s25  }
   0x9   : > { %p1394_p5 = por %p167_p2, %p166_p0  ;;  %p1398_p6 = por %p173_p4, %p172_p3 }
   0xa   : > { %p1111_p7 = scmp.ge.s32.totalorder %s1319_s21, 1  ;;  %p221_p8 = scmp.lt.s32.totalorder %s1319_s21, 3 }
   0xc   : > { %p222_p9 = pnand %p1111_p7, %p221_p8 }
   0xd   : > { %p267_p10 = scmp.lt.s32.totalorder (!%p222_p9), %s1377_s22, 1  ;;  %s264_s25 = sand.u32 (!%p222_p9), 1, %s1311_s19  }
   0xe   : > { %225 = sbr.rel (%p222_p9) target bundleno = 739 (0x2e3), region = 36  ;;  %s1112_s26 = sshll.u32 (!%p222_p9), %s264_s25, 5 }
   0xf   : > { %s1143_s7 = sshll.u32 (!%p222_p9), %s1377_s22, 9 }
  0x10   : > { %s1482_s11 = scalar_lea.hbm (!%p222_p9), %s1541_s5, %s1143_s7 }
  0x13   : > { %v1321_v0 = vmov 0.0   ;;  %vm1322_vm0 = vmmov 0   ;;  %s1409_s30 = scalar_select %p267_p10, %s1377_s22, 1  ;;  %vm302_vm1 = vcmask 64512  }
  0x14   : > { %1160 = vmatprep.subr.mxu0 %v1321_v0  ;;  %1162 = vmatprep.mubr.msk.f32.mxu0 %vm1322_vm0, %v1321_v0  ;;  %s1323_s22 = smov [#allocation2]  }
  0x15   : > { %1165 = vmatprep.subr.mxu1 %v1321_v0  ;;  %1167 = vmatprep.mubr.msk.f32.mxu1 %vm1322_vm0, %v1321_v0  ;;  %s1415_s6 = sshll.u32 %s1409_s30, 5  ;;  %s284_s15 = scalar_lea.vmem %s1539_s3, %s1409_s30 }
  0x16   : > { %s276_s9 = scalar_lea.vmem %s1537_s1, %s1415_s6  ;;  %s271_s12 = scalar_lea.vmem %s1536_s0, %s1415_s6  ;;  %v1129_v11 = vld [vmem:[%s284_s15] ss:$0 sm:$0xff] }
  0x17   : > { %v294_v1 = vld [vmem:[%s276_s9] sm:$0xff]  ;;  %v295_v2 = vld [vmem:[%s276_s9 + $0x8] sm:$0xff]  ;;  %v296_v5 = vld [vmem:[%s276_s9 + $0x10] sm:$0xff]  ;;  %s281_s23 = scalar_lea.vmem %s1538_s2, %s1415_s6  ;;  %s266_s30 = scalar_lea.vmem [#allocation2], %s1112_s26 }
  0x18   : > { %1161 = vmatpush3.xpose.msk.msra.mxu0 %vm302_vm1, %v294_v1  ;;  %v290_v3 = vld [vmem:[%s271_s12] sm:$0xff]  ;;  %1166 = vmatpush3.xpose.msk.msra.mxu1 %vm302_vm1, %v295_v2  ;;  %v291_v4 = vld [vmem:[%s271_s12 + $0x8] sm:$0xff]  ;;  %v297_v6 = vld [vmem:[%s276_s9 + $0x18] sm:$0xff]  ;;  %s988_s8 = sshll.u32 %s266_s30, 4  ;;  %s1263_s14 = sshll.u32 %s1323_s22, 4  ;;  %s1484_s8 = int_to_ptr.vmem [resolvable:$true] %s988_s8  ;;  %s1264_s14 = int_to_ptr.vmem [resolvable:$false] %s1263_s14 }
  0x19   : > { %1170 = vmatprep.subr.mxu0 %v1321_v0  ;;  %1175 = vmatprep.subr.mxu1 %v1321_v0  ;;  %v292_v7 = vld [vmem:[%s271_s12 + $0x10] sm:$0xff]  ;;  %v293_v8 = vld [vmem:[%s271_s12 + $0x18] sm:$0xff]  ;;  %v298_v50 = vld [vmem:[%s281_s23] sm:$0xff]  ;;  %s1488_s12 = scalar_lea.sflag [#allocation3], %s264_s25  ;;  %s1259_s13 = scalar_lea.vmem %s1484_s8, 512 }
  0x1a   : > { %v299_v51 = vld [vmem:[%s281_s23 + $0x8] sm:$0xff]  ;;  %v300_v58 = vld [vmem:[%s281_s23 + $0x10] sm:$0xff]  ;;  %v301_v62 = vld [vmem:[%s281_s23 + $0x18] sm:$0xff]  ;;  %p1260_p11 = scmp.ne.s32.totalorder %s1484_s8, %s1259_s13  ;;  %s1265_s15 = scalar_lea.vmem %s1264_s14, 1024 }
  0x1b   : > { %1163 = vmatmul.mubr.msk.f32.vlgmr.msra.gmra.mxu0 %vm302_vm1, %v290_v3  ;;  %1168 = vmatmul.mubr.msk.f32.vlgmr.msra.gmra.mxu1 %vm302_vm1, %v291_v4  ;;  %p1266_p0 = scmp.lt.s32.totalorder %s1484_s8, %s1264_s14  ;;  %p1267_p1 = scmp.lt.s32.totalorder %s1265_s15, %s1259_s13 }
  0x1c   : > { %1171 = vmatpush3.xpose.msk.msra.mxu0 %vm302_vm1, %v296_v5  ;;  %1172 = vmatprep.mubr.msk.f32.mxu0 %vm1322_vm0, %v1321_v0  ;;  %p1261_p12 = pnand %p1260_p11, %p1394_p5 }
  0x1d   : > { %1176 = vmatpush3.xpose.msk.msra.mxu1 %vm302_vm1, %v297_v6  ;;  %1177 = vmatprep.mubr.msk.f32.mxu1 %vm1322_vm0, %v1321_v0  ;;  %p1268_p2 = por %p1267_p1, %p1266_p0 }
  0x1e   : > { %1180 = vmatprep.subr.mxu0 %v1321_v0  ;;  %1185 = vmatprep.subr.mxu1 %v1321_v0  ;;  %p1262_p13 = pneg %p1261_p12 }
  0x1f   : > { %1173 = vmatmul.mubr.msk.f32.vlgmr.msra.gmra.mxu0 %vm302_vm1, %v292_v7 }
  0x20   : > { %1178 = vmatmul.mubr.msk.f32.vlgmr.msra.gmra.mxu1 %vm302_vm1, %v293_v8  ;;  %1182 = vmatprep.mubr.msk.f32.mxu0 %vm1322_vm0, %v1321_v0  ;;  %p1269_p3 = pnand %p1268_p2, %p1262_p13 }
  0x21   : > { %1187 = vmatprep.mubr.msk.f32.mxu1 %vm1322_vm0, %v1321_v0  ;;  %1181 = vmatpush3.msra.mxu0 %v298_v50 }
  0x22   : > { %1190 = vmatprep.subr.mxu0 %v1321_v0  ;;  %1186 = vmatpush3.msra.mxu1 %v299_v51 }
  0x23   : > { %1195 = vmatprep.subr.mxu1 %v1321_v0 }
  0xdb   : > { %v375_v9 = vpop.f32.mrf.mxu0  ;;  %v451_v10 = vpop.f32.mrf.mxu1 }
  0xdc   : > { %v607_v12 = vmul.f32 0.35355338, %v375_v9  ;;  %v608_v13 = vmul.f32 0.35355338, %v451_v10 }
  0xdd   : > { %v1164_v14 = vpop.f32.mrf.mxu0  ;;  %v1169_v15 = vpop.f32.mrf.mxu1 }
  0xde   : > { %v618_v16 = vadd.f32 %v1129_v11, %v607_v12  ;;  %v619_v17 = vadd.f32 %v1129_v11, %v608_v13 }
  0xdf   : > { %v527_v18 = vpop.f32.mrf.mxu0 }
  0xe0   : > { %v609_v19 = vmul.f32 0.35355338, %v527_v18  ;;  %v622_v20 = vsel %vm302_vm1, %v618_v16, -inf  ;;  %v603_v21 = vpop.f32.mrf.mxu1  ;;  %v625_v25 = vsel %vm302_vm1, %v619_v17, -inf }
  0xe1   : > { %623 = vmax.xlane.f32.xlu0 %v622_v20  ;;  %v1174_v22 = vpop.f32.mrf.mxu0  ;;  %v610_v23 = vmul.f32 0.35355338, %v603_v21 }
  0xe2   : > { %v1179_v24 = vpop.f32.mrf.mxu1  ;;  %v620_v26 = vadd.f32 %v1129_v11, %v609_v19 }
  0xe3   : > { %v621_v27 = vadd.f32 %v1129_v11, %v610_v23 }
  0xe4   : > { %v628_v28 = vsel %vm302_vm1, %v620_v26, -inf }
  0xe5   : > { %626 = vmax.xlane.f32.xlu0 %v625_v25  ;;  %629 = vmax.xlane.f32.xlu1 %v628_v28  ;;  %v631_v29 = vsel %vm302_vm1, %v621_v27, -inf }
  0xe9   : > { %632 = vmax.xlane.f32.xlu1 %v631_v29 }
 0x16a   : > { %v624_v30 = vpop.xlane.xlu0 %623 }
 0x16b   : > { %v634_v31 = vsub.f32 %v618_v16, %v624_v30 }
 0x16d   : > { %v638_v32 = vmul.f32 1.442695, %v634_v31 }
 0x16e   : > { %v627_v33 = vpop.xlane.xlu0 %626  ;;  %v630_v34 = vpop.xlane.xlu1 %629 }
 0x16f   : > { %1243 = vpow2.f32 %v638_v32  ;;  %v635_v35 = vsub.f32 %v619_v17, %v627_v33  ;;  %v636_v36 = vsub.f32 %v620_v26, %v630_v34 }
 0x171   : > { %v640_v37 = vmul.f32 1.442695, %v635_v35  ;;  %v642_v38 = vmul.f32 1.442695, %v636_v36 }
 0x172   : > { %v633_v39 = vpop.xlane.xlu1 %632 }
 0x173   : > { %1245 = vpow2.f32 %v640_v37  ;;  %v637_v40 = vsub.f32 %v621_v27, %v633_v39 }
 0x174   : > { %1247 = vpow2.f32 %v642_v38 }
 0x175   : > { %v644_v41 = vmul.f32 1.442695, %v637_v40 }
 0x177   : > { %1249 = vpow2.f32 %v644_v41 }
 0x17c   : > { %v1244_v42 = vpop.eup %1243 }
 0x17d   : > { %v646_v43 = vsel %vm302_vm1, %v1244_v42, 0.0 }
 0x17e   : > { %647 = vadd.xlane.f32.xlu0 %v646_v43 }
 0x180   : > { %v1246_v44 = vpop.eup %1245 }
 0x181   : > { %v1248_v45 = vpop.eup %1247  ;;  %v649_v46 = vsel %vm302_vm1, %v1246_v44, 0.0 }
 0x182   : > { %650 = vadd.xlane.f32.xlu1 %v649_v46  ;;  %v652_v47 = vsel %vm302_vm1, %v1248_v45, 0.0 }
 0x183   : > { %653 = vadd.xlane.f32.xlu0 %v652_v47 }
 0x184   : > { %v1250_v48 = vpop.eup %1249 }
 0x185   : > { %v655_v49 = vsel %vm302_vm1, %v1250_v48, 0.0 }
 0x186   : > { %656 = vadd.xlane.f32.xlu1 %v655_v49 }
 0x207   : > { %v648_v52 = vpop.xlane.xlu0 %647 }
 0x208   : > { %1251 = vrcp.f32 %v648_v52 }
 0x20b   : > { %v651_v53 = vpop.xlane.xlu1 %650 }
 0x20c   : > { %v654_v54 = vpop.xlane.xlu0 %653  ;;  %1253 = vrcp.f32 %v651_v53 }
 0x20d   : > { %1255 = vrcp.f32 %v654_v54 }
 0x20f   : > { %v657_v55 = vpop.xlane.xlu1 %656 }
 0x210   : > { %1257 = vrcp.f32 %v657_v55 }
 0x215   : > { %v1252_v56 = vpop.eup %1251 }
 0x216   : > { %v659_v57 = vmul.f32 %v1252_v56, %v1244_v42 }
 0x218   : > { %666 = vst.msk [vmem:[%s266_s30] sm:$0xff] %vm302_vm1, %v659_v57  ;;  %1183 = vmatmul.mubr.msk.f32.vlgmr.msra.gmra.mxu0 %vm302_vm1, %v659_v57 }
 0x219   : > { %v1254_v59 = vpop.eup %1253  ;;  %1191 = vmatpush3.msra.mxu0 %v300_v58  ;;  %1192 = vmatprep.mubr.msk.f32.mxu0 %vm1322_vm0, %v1321_v0 }
 0x21a   : > { %v1256_v60 = vpop.eup %1255  ;;  %v661_v61 = vmul.f32 %v1254_v59, %v1246_v44 }
 0x21b   : > { %v663_v63 = vmul.f32 %v1256_v60, %v1248_v45 }
 0x21c   : > { %667 = vst.msk [vmem:[%s266_s30 + $0x8] sm:$0xff] %vm302_vm1, %v661_v61  ;;  %1188 = vmatmul.mubr.msk.f32.vlgmr.msra.gmra.mxu1 %vm302_vm1, %v661_v61 }
 0x21d   : > { %v1258_v1 = vpop.eup %1257  ;;  %668 = vst.msk [vmem:[%s266_s30 + $0x10] sm:$0xff] %vm302_vm1, %v663_v63  ;;  %1193 = vmatmul.mubr.msk.f32.vlgmr.msra.gmra.mxu0 %vm302_vm1, %v663_v63  ;;  %1196 = vmatpush3.msra.mxu1 %v301_v62 }
 0x21e   : > { %1197 = vmatprep.mubr.msk.f32.mxu1 %vm1322_vm0, %v1321_v0  ;;  %v665_v2 = vmul.f32 %v1258_v1, %v1250_v48 }
 0x220   : > { %669 = vst.msk [vmem:[%s266_s30 + $0x18] sm:$0xff] %vm302_vm1, %v665_v2  ;;  %1198 = vmatmul.mubr.msk.f32.vlgmr.msra.gmra.mxu1 %vm302_vm1, %v665_v2 }
 0x221   : > { %1272 = shalt.err (!%p1269_p3)
}
 0x222   : > { %s1273_s16 = scalar_lea.hbm %s1482_s11, 512  ;;  %s1277_s25 = scalar_lea.hbm %s1541_s5, 1024 }
 0x223   : > { %p1274_p4 = scmp.ne.s32.totalorder %s1482_s11, %s1273_s16  ;;  %p1278_p9 = scmp.lt.s32.totalorder %s1482_s11, %s1541_s5 }
 0x224   : > { %p1279_p10 = scmp.lt.s32.totalorder %s1277_s25, %s1273_s16 }
 0x225   : > { %p1275_p7 = pnand %p1274_p4, %p1394_p5 }
 0x226   : > { %p1280_p11 = por %p1279_p10, %p1278_p9 }
 0x227   : > { %p1276_p8 = pneg %p1275_p7 }
 0x229   : > { %p1281_p12 = pnand %p1280_p11, %p1276_p8 }
 0x22b   : > { %1284 = shalt.err (!%p1281_p12)
}
 0x22c   : > { %s1324_s7 = smov 128   ;;  %s1325_s9 = smov 8  }
 0x22d   : > { %1200 = dma.vmem_to_hbm [thread:$0]  (%p1394_p5), %s1484_s8, 512, %s1482_s11, %s1488_s12, %s1324_s7, %s1324_s7, %s1325_s9  }
 0x22e   : > { %s289_s22 = scalar_lea.vmem %s1540_s4, %s1415_s6 }
 0x2d8   : > { %v739_v0 = vpop.f32.mrf.mxu0 }
 0x2d9   : > { %962 = vst.msk [vmem:[%s289_s22] sm:$0xff] %vm302_vm1, %v739_v0 }
 0x2da   : > { %v1184_v3 = vpop.f32.mrf.mxu0 }
 0x2dc   : > { %v812_v4 = vpop.f32.mrf.mxu1 }
 0x2dd   : > { %963 = vst.msk [vmem:[%s289_s22 + $0x8] sm:$0xff] %vm302_vm1, %v812_v4  ;;  %v885_v5 = vpop.f32.mrf.mxu0 }
 0x2de   : > { %964 = vst.msk [vmem:[%s289_s22 + $0x10] sm:$0xff] %vm302_vm1, %v885_v5  ;;  %v1189_v6 = vpop.f32.mrf.mxu1 }
 0x2df   : > { %v1194_v7 = vpop.f32.mrf.mxu0 }
 0x2e0   : > { %v958_v8 = vpop.f32.mrf.mxu1 }
 0x2e1   : > { %965 = vst.msk [vmem:[%s289_s22 + $0x18] sm:$0xff] %vm302_vm1, %v958_v8 }
 0x2e2   : > { %v1199_v9 = vpop.f32.mrf.mxu1 }
 0x2e3 PF: > { %p1206_p5 = scmp.ge.s32.totalorder %s1319_s21, 2  ;;  %s1011_s28 = sand.u32 1, %s1307_s18  }
 0x2e4   : > { %s1012_s6 = scalar_lea.sflag [#allocation3], %s1011_s28 }
 0x2e5   : > { %p1203_p13 = pnand %p1206_p5, %p1398_p6 }
 0x2e7   : > { %p1204_p0 = pneg %p1203_p13 }
 0x2e9   : > { %1302 = dma.done.wait (%p1204_p0), %s1012_s6, 512  }
 0x2ea   : > { %1304 = vsyncadd (%p1204_p0), %s1012_s6, 4294966784  ;;  %p16_p1 = scmp.ge.s32.totalorder %s1381_s24, 4   ;;  %s1544_s18 = smov %s1311_s19 }
 0x2eb   : > { %s1545_s19 = smov %s1315_s20  ;;  %s1546_s20 = smov %s1392_s27 }
 0x2ec   : > { %s1547_s21 = smov %s1381_s24  ;;  %18 = sbr.rel (!%p16_p1) target bundleno = 3 (0x3), region = 92 }
 0x2f1   :  { %1017 = vsyncpa [#allocation3], 1 }
 0x2f2   :  { %1019 = vsyncpa [#allocation3 + $0x1], 1 }

// kernel: bert_crop_forward.21
= control target key start
LH: loop header
LB: loop body
LE: loop exit
PB: predicated region body
PF: predicated region fallthrough
CT: control target
= control target key end

     0   :  { %vm18_vm0 = vcmask 261120   ;;  %vm33_vm1 = vcmask 523264   ;;  %v173_v2 = vmov 0.0   ;;  %s241_s1 = inlined_call_operand.vmem [shape: f32[64,32], index: 1, kind: input, shape index: {}]   ;;  %s242_s0 = inlined_call_operand.vmem [shape: f32[16,64], index: 0, kind: input, shape index: {}]   ;;  %s243_s2 = inlined_call_operand.vmem [shape: f32[1,32], index: 2, kind: input, shape index: {}]   ;;  %s244_s3 = inlined_call_operand.vmem [shape: f32[16,32], index: 3, kind: output, shape index: {}]  }
   0x1   :  { %v30_v0 = vld [vmem:[%s241_s1 + $0x38] sm:$0xff]  ;;  %v29_v1 = vld [vmem:[%s241_s1 + $0x30] sm:$0xff]  ;;  %20 = vst.msk [vmem:[#allocation2 + $0x8] sm:$0xff] %vm18_vm0, %v173_v2  ;;  %19 = vst.msk [vmem:[#allocation2] sm:$0xff] %vm18_vm0, %v173_v2 }
   0x2   :  { %153 = vmatprep.subr.mxu0 %v30_v0  ;;  %v28_v3 = vld [vmem:[%s241_s1 + $0x28] sm:$0xff]  ;;  %v21_v4 = vld [vmem:[%s242_s0] sm:$0xff]  ;;  %v26_v6 = vld [vmem:[%s241_s1 + $0x18] sm:$0xff] }
   0x3   :  { %154 = vmatpush3.msra.mxu0 %v30_v0  ;;  %169 = vmatprep.mubr.msk.f32.mxu0 %vm33_vm1, %v21_v4  ;;  %v27_v5 = vld [vmem:[%s241_s1 + $0x20] sm:$0xff]  ;;  %v25_v7 = vld [vmem:[%s241_s1 + $0x10] sm:$0xff]  ;;  %v24_v8 = vld [vmem:[%s241_s1 + $0x8] sm:$0xff] }
   0x4   :  { %155 = vmatprep.subr.mxu0 %v29_v1  ;;  %v23_v9 = vld [vmem:[%s241_s1] sm:$0xff]  ;;  %v22_v10 = vld [vmem:[%s242_s0 + $0x8] sm:$0xff] }
   0x5   :  { %156 = vmatpush3.msra.mxu0 %v29_v1  ;;  %v142_v17 = vld [vmem:[%s243_s2] ss:$0 sm:$0xff] }
   0x6   :  { %157 = vmatprep.subr.mxu0 %v28_v3 }
   0x7   :  { %158 = vmatpush3.msra.mxu0 %v28_v3 }
   0x8   :  { %159 = vmatprep.subr.mxu0 %v27_v5  ;;  %v32_v11 = vld [vmem:[#allocation2 + $0x8] sm:$0xff]  ;;  %v31_v13 = vld [vmem:[#allocation2] sm:$0xff] }
   0x9   :  { %160 = vmatpush3.msra.mxu0 %v27_v5 }
   0xa   :  { %161 = vmatprep.subr.mxu0 %v26_v6 }
   0xb   :  { %162 = vmatpush3.msra.mxu0 %v26_v6 }
   0xc   :  { %163 = vmatprep.subr.mxu0 %v25_v7 }
   0xd   :  { %164 = vmatpush3.msra.mxu0 %v25_v7 }
   0xe   :  { %165 = vmatprep.subr.mxu0 %v24_v8 }
   0xf   :  { %166 = vmatpush3.msra.mxu0 %v24_v8 }
  0x10   :  { %167 = vmatprep.subr.mxu0 %v23_v9 }
  0x11   :  { %168 = vmatpush3.msra.mxu0 %v23_v9 }
  0x12   :  { %170 = vmatmul.mubr.msk.f32.vlgmr.msra.gmra.mxu0 %vm33_vm1, %v22_v10 }
  0xd2   :  { %v171_v12 = vpop.f32.mrf.mxu0 }
  0xd3   :  { %v116_v14 = vadd.f32 %v171_v12, %v32_v11 }
  0xd4   :  { %v106_v15 = vpop.f32.mrf.mxu0 }
  0xd5   :  { %119 = vst.msk [vmem:[#allocation2 + $0x8] sm:$0xff] %vm18_vm0, %v116_v14  ;;  %v115_v16 = vadd.f32 %v106_v15, %v31_v13 }
  0xd7   :  { %118 = vst.msk [vmem:[#allocation2] sm:$0xff] %vm18_vm0, %v115_v16 }
  0xdc   :  { %v124_v18 = vld [vmem:[#allocation2 + $0x8] sm:$0xff] }
  0xdd   :  { %v133_v19 = vadd.f32 %v142_v17, %v124_v18 }
  0xde   :  { %v123_v20 = vld [vmem:[#allocation2] sm:$0xff] }
  0xdf   :  { %135 = vst.msk [vmem:[%s244_s3 + $0x8] sm:$0xff] %vm18_vm0, %v133_v19  ;;  %v132_v21 = vadd.f32 %v142_v17, %v123_v20 }
  0xe1   :  { %134 = vst.msk [vmem:[%s244_s3] sm:$0xff] %vm18_vm0, %v132_v21 }

// kernel: bert_crop_forward.20
= control target key start
LH: loop header
LB: loop body
LE: loop exit
PB: predicated region body
PF: predicated region fallthrough
CT: control target
= control target key end

     0   :  { %vm29_vm0 = vcmask 261120   ;;  %vm18_vm1 = vcmask 523264   ;;  %v179_v2 = vmov 0.0   ;;  %s235_s1 = inlined_call_operand.vmem [shape: f32[32,64], index: 1, kind: input, shape index: {}]   ;;  %s236_s0 = inlined_call_operand.vmem [shape: f32[16,32], index: 0, kind: input, shape index: {}]   ;;  %s237_s2 = inlined_call_operand.vmem [shape: f32[1,64], index: 2, kind: input, shape index: {}]   ;;  %s238_s3 = inlined_call_operand.vmem [shape: f32[16,64], index: 3, kind: output, shape index: {}]  }
   0x1   :  { %v26_v0 = vld [vmem:[%s235_s1 + $0x18] sm:$0xff]  ;;  %v25_v1 = vld [vmem:[%s235_s1 + $0x10] sm:$0xff]  ;;  %20 = vst.msk [vmem:[#allocation2 + $0x8] sm:$0xff] %vm18_vm1, %v179_v2  ;;  %19 = vst.msk [vmem:[#allocation2] sm:$0xff] %vm18_vm1, %v179_v2 }
   0x2   :  { %163 = vmatprep.subr.mxu0 %v26_v0  ;;  %v21_v3 = vld [vmem:[%s236_s0] sm:$0xff]  ;;  %v24_v4 = vld [vmem:[%s235_s1 + $0x8] sm:$0xff] }
   0x3   :  { %164 = vmatpush3.msra.mxu0 %v26_v0  ;;  %171 = vmatprep.mubr.msk.f32.mxu0 %vm29_vm0, %v21_v3  ;;  %v23_v5 = vld [vmem:[%s235_s1] sm:$0xff]  ;;  %v22_v6 = vld [vmem:[%s236_s0 + $0x8] sm:$0xff] }
   0x4   :  { %165 = vmatprep.subr.mxu0 %v25_v1  ;;  %v156_v13 = vld [vmem:[%s237_s2] ss:$0 sm:$0xff] }
   0x5   :  { %166 = vmatpush3.msra.mxu0 %v25_v1 }
   0x6   :  { %167 = vmatprep.subr.mxu0 %v24_v4 }
   0x7   :  { %168 = vmatpush3.msra.mxu0 %v24_v4 }
   0x8   :  { %169 = vmatprep.subr.mxu0 %v23_v5  ;;  %v28_v7 = vld [vmem:[#allocation2 + $0x8] sm:$0xff]  ;;  %v27_v9 = vld [vmem:[#allocation2] sm:$0xff] }
   0x9   :  { %170 = vmatpush3.msra.mxu0 %v23_v5 }
   0xa   :  { %172 = vmatmul.mubr.msk.f32.vlgmr.msra.gmra.mxu0 %vm29_vm0, %v22_v6 }
  0xca   :  { %v173_v8 = vpop.f32.mrf.mxu0 }
  0xcb   :  { %v112_v10 = vadd.f32 %v173_v8, %v28_v7 }
  0xcc   :  { %v102_v11 = vpop.f32.mrf.mxu0 }
  0xcd   :  { %115 = vst.msk [vmem:[#allocation2 + $0x8] sm:$0xff] %vm18_vm1, %v112_v10  ;;  %v111_v12 = vadd.f32 %v102_v11, %v27_v9 }
  0xcf   :  { %114 = vst.msk [vmem:[#allocation2] sm:$0xff] %vm18_vm1, %v111_v12 }
  0xd4   :  { %v120_v14 = vld [vmem:[#allocation2 + $0x8] sm:$0xff] }
  0xd5   :  { %v129_v15 = vadd.f32 %v156_v13, %v120_v14 }
  0xd6   :  { %v119_v16 = vld [vmem:[#allocation2] sm:$0xff] }
  0xd7   :  { %v133_v17 = vmul.f32 0.044715, %v129_v15  ;;  %v128_v18 = vadd.f32 %v156_v13, %v119_v16  ;;  %v131_v29 = vmul.f32 0.5, %v129_v15 }
  0xd9   :  { %v135_v19 = vmul.f32 %v133_v17, %v129_v15  ;;  %v132_v20 = vmul.f32 0.044715, %v128_v18  ;;  %v130_v33 = vmul.f32 0.5, %v128_v18 }
  0xdb   :  { %v137_v21 = vmul.f32 %v135_v19, %v129_v15  ;;  %v134_v22 = vmul.f32 %v132_v20, %v128_v18 }
  0xdd   :  { %v139_v23 = vadd.f32 %v137_v21, %v129_v15  ;;  %v136_v24 = vmul.f32 %v134_v22, %v128_v18 }
  0xdf   :  { %v141_v25 = vmul.f32 0.7978846, %v139_v23  ;;  %v138_v26 = vadd.f32 %v136_v24, %v128_v18 }
  0xe1   :  { %175 = vtanh.f32 %v141_v25  ;;  %v140_v27 = vmul.f32 0.7978846, %v138_v26 }
  0xe3   :  { %177 = vtanh.f32 %v140_v27 }
  0xee   :  { %v176_v28 = vpop.eup %175 }
  0xef   :  { %v145_v30 = vadd.f32 1.0, %v176_v28 }
  0xf0   :  { %v178_v31 = vpop.eup %177 }
  0xf1   :  { %v147_v32 = vmul.f32 %v145_v30, %v131_v29  ;;  %v144_v34 = vadd.f32 1.0, %v178_v31 }
  0xf3   :  { %149 = vst.msk [vmem:[%s238_s3 + $0x8] sm:$0xff] %vm18_vm1, %v147_v32  ;;  %v146_v35 = vmul.f32 %v144_v34, %v130_v33 }
  0xf5   :  { %148 = vst.msk [vmem:[%s238_s3] sm:$0xff] %vm18_vm1, %v146_v35 }

// kernel: bert_crop_forward.19
= control target key start
LH: loop header
LB: loop body
LE: loop exit
PB: predicated region body
PF: predicated region fallthrough
CT: control target
= control target key end

     0   :  { %vm23_vm0 = vcmask 261120   ;;  %s136_s0 = inlined_call_operand.vmem [shape: f32[16,32], index: 0, kind: input, shape index: {}]   ;;  %s137_s1 = inlined_call_operand.vmem [shape: f32[16,32], index: 1, kind: input, shape index: {}]   ;;  %s138_s2 = inlined_call_operand.vmem [shape: f32[1,32], index: 2, kind: input, shape index: {}]   ;;  %s139_s3 = inlined_call_operand.vmem [shape: f32[1,32], index: 3, kind: input, shape index: {}]   ;;  %s140_s4 = inlined_call_operand.vmem [shape: f32[16,32], index: 4, kind: output, shape index: {}]  }
   0x1   :  { %v17_v0 = vld [vmem:[%s136_s0] sm:$0xff]  ;;  %v18_v2 = vld [vmem:[%s136_s0 + $0x8] sm:$0xff] }
   0x2   :  { %v19_v1 = vld [vmem:[%s137_s1] sm:$0xff]  ;;  %v20_v4 = vld [vmem:[%s137_s1 + $0x8] sm:$0xff] }
   0x3   :  { %v21_v3 = vadd.f32 %v19_v1, %v17_v0  ;;  %v22_v5 = vadd.f32 %v20_v4, %v18_v2  ;;  %v75_v25 = vld [vmem:[%s138_s2] ss:$0 sm:$0xff] }
   0x4   :  { %v76_v27 = vld [vmem:[%s139_s3] ss:$0 sm:$0xff] }
   0x5   :  { %v24_v6 = vsel %vm23_vm0, %v21_v3, 0.0  ;;  %v27_v7 = vsel %vm23_vm0, %v22_v5, 0.0 }
   0x6   :  { %25 = vadd.xlane.f32.xlu0 %v24_v6 }
   0xa   :  { %28 = vadd.xlane.f32.xlu0 %v27_v7 }
  0x8f   :  { %v26_v8 = vpop.xlane.xlu0 %25 }
  0x90   :  { %v31_v9 = vmul.f32 0.03125, %v26_v8 }
  0x92   :  { %v33_v10 = vsub.f32 %v21_v3, %v31_v9 }
  0x93   :  { %v29_v11 = vpop.xlane.xlu0 %28 }
  0x94   :  { %v32_v12 = vmul.f32 0.03125, %v29_v11  ;;  %v35_v13 = vmul.f32 %v33_v10, %v33_v10 }
  0x96   :  { %v34_v14 = vsub.f32 %v22_v5, %v32_v12  ;;  %v37_v15 = vsel %vm23_vm0, %v35_v13, 0.0 }
  0x97   :  { %38 = vadd.xlane.f32.xlu1 %v37_v15 }
  0x98   :  { %v36_v16 = vmul.f32 %v34_v14, %v34_v14 }
  0x9a   :  { %v40_v17 = vsel %vm23_vm0, %v36_v16, 0.0 }
  0x9b   :  { %41 = vadd.xlane.f32.xlu1 %v40_v17 }
 0x120   :  { %v39_v18 = vpop.xlane.xlu1 %38 }
 0x121   :  { %v43_v19 = vmul.f32 0.03125, %v39_v18 }
 0x123   :  { %v45_v20 = vadd.f32 1e-12, %v43_v19 }
 0x124   :  { %v42_v21 = vpop.xlane.xlu1 %41 }
 0x125   :  { %77 = vrsqrt.f32 %v45_v20  ;;  %v44_v22 = vmul.f32 0.03125, %v42_v21 }
 0x127   :  { %v46_v23 = vadd.f32 1e-12, %v44_v22 }
 0x129   :  { %79 = vrsqrt.f32 %v46_v23 }
 0x132   :  { %v78_v24 = vpop.eup %77 }
 0x133   :  { %v49_v26 = vmul.f32 %v78_v24, %v33_v10 }
 0x135   :  { %v58_v28 = vmul.f32 %v75_v25, %v49_v26 }
 0x136   :  { %v80_v29 = vpop.eup %79 }
 0x137   :  { %v67_v30 = vadd.f32 %v76_v27, %v58_v28  ;;  %v50_v31 = vmul.f32 %v80_v29, %v34_v14 }
 0x139   :  { %69 = vst.msk [vmem:[%s140_s4] sm:$0xff] %vm23_vm0, %v67_v30  ;;  %v59_v32 = vmul.f32 %v75_v25, %v50_v31 }
 0x13b   :  { %v68_v33 = vadd.f32 %v76_v27, %v59_v32 }
 0x13d   :  { %70 = vst.msk [vmem:[%s140_s4 + $0x8] sm:$0xff] %vm23_vm0, %v68_v33 }

</bundles_post_ra>
